<compile_context>
chip_gen: v6e
topology: v6e:2x2x1
jax: 0.10.0
libtpu: 0.0.40
codegen_flags: <defaults>
</compile_context>

<pallas_src>
import functools

import jax
import jax.numpy as jnp
from jax.experimental import pallas as pl
from jax.experimental.pallas import tpu as pltpu

NEG_SLOPE = 0.01  # nn.LeakyReLU() default negative slope


# ----------------------------- Pallas kernel --------------------------------

def _chain_kernel(*refs, n_x, n_w, n_b, x_names, program, out_names):
    """Executes a small static "program" of fused linear steps, all VMEM-resident.

    Each step: (out_name, terms, bias_idx, residual_name)
      terms: ((in_name, weight_idx_or_None, leaky_act_bool), ...)
        weight_idx -> MXU matmul (bf16 in, f32 acc); None -> identity add.
      out = sum_i term_i [+ bias] [+ env[residual_name]]
    """
    x_refs = refs[:n_x]
    w_refs = refs[n_x:n_x + n_w]
    b_refs = refs[n_x + n_w:n_x + n_w + n_b]
    out_refs = refs[n_x + n_w + n_b:]

    def lrelu(v):
        return jnp.where(v >= 0, v, NEG_SLOPE * v)          # f32 on the VPU

    env = {name: x_refs[i][...] for i, name in enumerate(x_names)}
    for out_name, terms, bias_idx, res_name in program:
        acc = None
        for in_name, w_idx, act in terms:
            v = env[in_name]
            if act:
                v = lrelu(v)
            if w_idx is None:
                d = v
            else:
                d = jnp.dot(v.astype(jnp.bfloat16), w_refs[w_idx][...],
                            preferred_element_type=jnp.float32)
            acc = d if acc is None else acc + d
        if bias_idx is not None:
            acc = acc + b_refs[bias_idx][...]
        if res_name is not None:
            acc = acc + env[res_name]
        env[out_name] = acc
    for i, name in enumerate(out_names):
        out_refs[i][...] = env[name].astype(out_refs[i].dtype)


# ----------------------------- kernel wrapper --------------------------------

def chain_call(inputs, program, out_names, *, tm_cap=256):
    """Runs `program` (see _chain_kernel) as ONE pallas_call.

    inputs  : dict name -> (M, K) f32 array (rows are the only tiled axis)
    program : steps whose terms reference WEIGHT ARRAYS directly
              (in_name, weight (K,N) or None, act_bool); bias (1,N)/(N,) or None.
    """
    x_names = tuple(inputs.keys())
    xs = [jnp.asarray(inputs[k], jnp.float32) for k in x_names]
    M = xs[0].shape[0]

    dims = {k: x.shape[1] for k, x in zip(x_names, xs)}
    weights, biases, prog = [], [], []
    for out_name, terms, bias, res in program:
        t_idx, n = [], None
        for name, w, act in terms:
            if w is None:
                t_idx.append((name, None, bool(act)))
                n = dims[name] if n is None else n
            else:
                weights.append(jnp.asarray(w, jnp.bfloat16))
                t_idx.append((name, len(weights) - 1, bool(act)))
                n = int(w.shape[1])
        if bias is None:
            b_idx = None
        else:
            biases.append(jnp.asarray(bias, jnp.float32).reshape(1, -1))
            b_idx = len(biases) - 1
        prog.append((out_name, tuple(t_idx), b_idx, res))
        dims[out_name] = n
    out_dims = tuple(dims[name] for name in out_names)

    if M <= tm_cap:
        tm, gm = M, 1
    else:
        tm, gm = tm_cap, pl.cdiv(M, tm_cap)

    in_specs, operands = [], []
    for x in xs:
        in_specs.append(pl.BlockSpec((tm, x.shape[1]), lambda i: (i, 0)))
        operands.append(x)
    for w in weights:
        in_specs.append(pl.BlockSpec(w.shape, lambda i: (0, 0)))
        operands.append(w)
    for b in biases:
        in_specs.append(pl.BlockSpec(b.shape, lambda i: (0, 0)))
        operands.append(b)

    out_shape = tuple(jax.ShapeDtypeStruct((M, d), jnp.float32) for d in out_dims)
    out_specs = tuple(pl.BlockSpec((tm, d), lambda i: (i, 0)) for d in out_dims)

    kern = functools.partial(
        _chain_kernel, n_x=len(xs), n_w=len(weights), n_b=len(biases),
        x_names=x_names, program=tuple(prog), out_names=tuple(out_names))

    outs = pl.pallas_call(
        kern,
        out_shape=out_shape,
        grid=(gm,),
        in_specs=in_specs,
        out_specs=out_specs,
        compiler_params=pltpu.CompilerParams(
            dimension_semantics=("parallel",)),   # rows shard over v7x's 2 TCs
    )(*operands)
    if not isinstance(outs, (tuple, list)):
        outs = (outs,)
    return tuple(outs)


# ----------------------------- layout helpers --------------------------------

def nchw_to_flat(x):
    """(B,C,H,W) -> (B, H*W*C) with (h, w, c) ordering (channel fastest)."""
    b, c, h, w = x.shape
    return jnp.transpose(x, (0, 2, 3, 1)).reshape(b, h * w * c)


def flat_to_nchw(x, h, w, c):
    b = x.shape[0]
    return jnp.transpose(x.reshape(b, h, w, c), (0, 3, 1, 2))


# ----------------------------- weight preparation ----------------------------

def conv3x3_to_dense(w3, H, W):
    """3x3 same-pad conv at spatial HxW as a dense (H*W*Cin, H*W*Cout) matrix
    acting on the channel-last flattened (h, w, c) vector (exact)."""
    cout, cin = w3.shape[0], w3.shape[1]
    zero = jnp.zeros((cin, cout), w3.dtype)
    cols = []
    for oh in range(H):
        for ow in range(W):
            rows = []
            for ih in range(H):
                for iw in range(W):
                    u, v = ih - oh + 1, iw - ow + 1
                    if 0 <= u <= 2 and 0 <= v <= 2:
                        rows.append(jnp.transpose(w3[:, :, u, v]))  # (Cin, Cout)
                    else:
                        rows.append(zero)
            cols.append(jnp.concatenate(rows, axis=0))
    return jnp.concatenate(cols, axis=1)


def prepare_params(params, n_stages, nf):
    """One-time rearrangement of PyTorch-layout weights into kernel-ready dense
    bf16 matrices (done once, outside the jitted forward)."""
    s_top, s_bot = f"s{n_stages}", f"s{n_stages - 1}"
    bf = lambda a: a.astype(jnp.bfloat16)

    def t1x1(w):                            # torch (Cout,Cin,1,1) -> (Cin,Cout)
        cout, cin = w.shape[0], w.shape[1]
        return jnp.transpose(w.reshape(cout, cin))

    def kron_pix(w2d, s):                   # per-pixel 1x1 conv in flat space
        return jnp.kron(jnp.eye(s, dtype=w2d.dtype), w2d)

    def tile_b(b, s):
        return jnp.tile(b, s).reshape(1, -1).astype(jnp.float32)

    def resnet_skip_mats(p, hw):
        s = hw * hw
        c = p["pre"]["w"].shape[0]
        w3 = p["conv"]["w"]                 # (nf, 2nf, 3, 3)
        return {
            "w_pre": bf(kron_pix(t1x1(p["pre"]["w"]), s)),
            "b_pre": tile_b(p["pre"]["b"], s),
            "w_cx": bf(conv3x3_to_dense(w3[:, :c], hw, hw)),   # x-half of concat
            "w_ca": bf(conv3x3_to_dense(w3[:, c:], hw, hw)),   # a-half of concat
            "b_cv": tile_b(p["conv"]["b"], s),
        }

    def channel_norm_mats(p, hw):
        s = hw * hw
        wf = t1x1(p["w"])                   # (2nf, nf)
        half = wf.shape[0] // 2
        return {"w1": bf(kron_pix(wf[:half], s)),
                "w2": bf(kron_pix(wf[half:], s)),
                "b": tile_b(p["b"], s)}

    prep = {
        # kernel 1: conv1x1 + ResnetBlock s{n}_2 (spatial 1x1)
        "top_head": {
            "conv1x1_w": bf(t1x1(params["conv1x1"]["w"])),
            "conv1x1_b": tile_b(params["conv1x1"]["b"], 1),
            "blk": resnet_skip_mats(params["blocks"][f"{s_top}_2"], 1),
        },
        # kernel 2: channel_norm s{n} + ResnetBlock s{n}_1 + Upsample conv
        "top_tail": {
            "cn": channel_norm_mats(params["channel_norm"][s_top], 1),
            "blk": resnet_skip_mats(params["blocks"][f"{s_top}_1"], 1),
            "up_w": bf(conv3x3_to_dense(params["up"]["w"], 1, 1)),  # (nf, 4nf)
            "up_b": tile_b(params["up"]["b"], 1),
        },
        # kernel 3: ResnetBlock s{n-1}_2 + auto_blocks[0] + param_converter
        "bot_head": {
            "blk": resnet_skip_mats(params["blocks"][f"{s_bot}_2"], 2),
            "auto0_w": bf(conv3x3_to_dense(params["auto"][0]["conv"]["w"], 2, 2)),
            "auto0_b": tile_b(params["auto"][0]["conv"]["b"], 4),
            "pc_w": bf(t1x1(params["param_converter"]["w"])),       # (4nf, nf)
            "pc_b": tile_b(params["param_converter"]["b"], 1),
        },
        # kernel 4: the 3 autoregressive skip-Resnet blocks (spatial 1x1)
        "auto": [resnet_skip_mats(params["auto"][i], 1) for i in range(1, 4)],
        # kernel 5: channel_norm s{n-1} + ResnetBlock s{n-1}_1 (spatial 2x2)
        "bot_tail": {
            "cn": channel_norm_mats(params["channel_norm"][s_bot], 2),
            "blk": resnet_skip_mats(params["blocks"][f"{s_bot}_1"], 2),
        },
    }
    return prep


# ----------------------------- parameters ------------------------------------

def init_conv_params(key, cin, cout, k):
    fan_in = cin * k * k
    bound = 1.0 / (fan_in ** 0.5)
    kw_, kb_ = jax.random.split(key)
    w = jax.random.uniform(kw_, (cout, cin, k, k), jnp.float32, -bound, bound)
    b = jax.random.uniform(kb_, (cout,), jnp.float32, -bound, bound)
    return {"w": w, "b": b}


def build_params(key, n_stages, nf):
    # TODO(synk): NormConv2d's weight-normalization is not replicated; plain
    # Conv2d-style parameters are used (forward structure is identical).
    cnt = [0]

    def nk():
        cnt[0] += 1
        return jax.random.fold_in(key, cnt[0])

    params = {
        "conv1x1": init_conv_params(nk(), nf, nf, 1),
        "up": init_conv_params(nk(), nf, 4 * nf, 3),          # Upsample.op
        "channel_norm": {},
        "blocks": {},
        "auto": [],
        "param_converter": init_conv_params(nk(), 4 * nf, nf, 1),
    }
    for i_s in range(n_stages, n_stages - 2, -1):
        params["channel_norm"][f"s{i_s}"] = init_conv_params(nk(), 2 * nf, nf, 1)
        for ir in range(2):  # n_rnb = 2, use_skip=True
            params["blocks"][f"s{i_s}_{ir + 1}"] = {
                "pre": init_conv_params(nk(), nf, nf, 1),
                "conv": init_conv_params(nk(), 2 * nf, nf, 3),
            }
    for i_a in range(4):
        if i_a < 1:  # no skip
            params["auto"].append({"conv": init_conv_params(nk(), nf, nf, 3)})
        else:        # use_skip=True
            params["auto"].append({
                "pre": init_conv_params(nk(), nf, nf, 1),
                "conv": init_conv_params(nk(), 2 * nf, nf, 3),
            })
    return params


# ----------------------------- forward ----------------------------------------

def vunet_bottleneck_forward(prep, x_e, z_post, rng, *, n_stages, mode="train"):
    use_z = mode in ("train", "appearance_transfer")
    s_top, s_bot = f"s{n_stages}", f"s{n_stages - 1}"

    sp_top = x_e[f"{s_top}_2"].shape[-1]
    sp_bot = x_e[f"{s_bot}_2"].shape[-1]
    # TODO(synk): the fused layout identities assume the canonical VUnet
    # bottleneck spatial sizes (1x1 and 2x2).
    assert sp_top == 1 and sp_bot == 2
    name_top = f"{sp_top}by{sp_top}"      # "1by1"
    name_bot = f"{sp_bot}by{sp_bot}"      # "2by2"

    # NCHW at the PyTorch boundary -> flat channel-last internally.
    x_t2 = nchw_to_flat(x_e[f"{s_top}_2"])        # (B, nf)
    x_t1 = nchw_to_flat(x_e[f"{s_top}_1"])        # (B, nf)
    x_b2 = nchw_to_flat(x_e[f"{s_bot}_2"])        # (B, 4nf)
    x_b1 = nchw_to_flat(x_e[f"{s_bot}_1"])        # (B, 4nf)
    z_top = nchw_to_flat(z_post[name_top])        # (B, nf)
    z_bot = nchw_to_flat(z_post[name_bot])        # (B, 4nf) == SpaceToDepth output

    B, nf = x_t2.shape

    # TODO(synk): torch.randn latent sampling has no Pallas equivalent;
    # jax.random is used in the (jitted) glue instead of an in-kernel PRNG.
    def sample(mean, rng):
        rng, sub = jax.random.split(rng)
        return mean + jax.random.normal(sub, mean.shape, mean.dtype), rng

    p_params, z_prior = {}, {}

    # ===== kernel 1: conv1x1 + ResnetBlock s{n}_2 (1x1 stage head) ===========
    k = prep["top_head"]
    blk = k["blk"]
    (h_top,) = chain_call(
        {"x2": x_t2},
        program=(
            ("h0", (("x2", k["conv1x1_w"], False),), k["conv1x1_b"], None),
            ("ap", (("x2", blk["w_pre"], True),), blk["b_pre"], None),
            ("h", (("h0", blk["w_cx"], True), ("ap", blk["w_ca"], True)),
             blk["b_cv"], "h0"),
        ),
        out_names=("h",))
    p_params[name_top] = h_top
    prior_top, rng = sample(h_top, rng)
    z_prior[name_top] = prior_top

    z_cn = z_top if use_z else prior_top

    # ===== kernel 2: channel_norm + ResnetBlock s{n}_1 + Upsample conv =======
    k = prep["top_tail"]
    cn, blk = k["cn"], k["blk"]
    (h_up,) = chain_call(
        {"x1": x_t1, "z": z_cn, "h": h_top},
        program=(
            ("gz", (("x1", cn["w1"], False), ("z", cn["w2"], False)), cn["b"], None),
            ("ap", (("gz", blk["w_pre"], True),), blk["b_pre"], None),
            ("h2", (("h", blk["w_cx"], True), ("ap", blk["w_ca"], True)),
             blk["b_cv"], "h"),
            ("hu", (("h2", k["up_w"], False),), k["up_b"], None),
        ),
        out_names=("hu",))
    # DepthToSpace (1x1 -> 2x2) is the identity on the flat (h, w, c) layout.
    h = h_up                                              # (B, 4nf) at 2x2

    # ===== kernel 3: ResnetBlock s{n-1}_2 + auto_blocks[0] + param_converter ==
    k = prep["bot_head"]
    blk = k["blk"]
    h, pf0 = chain_call(
        {"h": h, "x2": x_b2},
        program=(
            ("ap", (("x2", blk["w_pre"], True),), blk["b_pre"], None),
            ("h2", (("h", blk["w_cx"], True), ("ap", blk["w_ca"], True)),
             blk["b_cv"], "h"),
            ("t", (("h2", k["auto0_w"], True),), k["auto0_b"], "h2"),
            # SpaceToDepth (2x2 -> 1x1) is the identity on the flat layout.
            ("pf", (("t", k["pc_w"], False),), k["pc_b"], None),
        ),
        out_names=("h2", "pf"))

    # ===== kernel 4: autoregressive prior over the 4 channel groups ==========
    noises = []
    for _ in range(4):
        rng, sub = jax.random.split(rng)
        noises.append(jax.random.normal(sub, (B, nf), jnp.float32))

    inputs = {"pf0": pf0}
    program = []
    for i in range(3):
        blk = prep["auto"][i]
        if use_z:
            inputs[f"fb{i}"] = z_bot[:, i * nf:(i + 1) * nf]   # z_groups[i]
        else:
            inputs[f"n{i}"] = noises[i]
            program.append((f"fb{i}",
                            ((f"pf{i}", None, False), (f"n{i}", None, False)),
                            None, None))                        # feedback = sample
        program.append((f"ap{i}", ((f"fb{i}", blk["w_pre"], True),),
                        blk["b_pre"], None))
        program.append((f"pf{i + 1}",
                        ((f"pf{i}", blk["w_cx"], True), (f"ap{i}", blk["w_ca"], True)),
                        blk["b_cv"], f"pf{i}"))
    pf1, pf2, pf3 = chain_call(inputs, program=tuple(program),
                               out_names=("pf1", "pf2", "pf3"))

    pfs = [pf0, pf1, pf2, pf3]
    samples = [pf + n for pf, n in zip(pfs, noises)]
    # __merge_groups = DepthToSpace(cat(.., ch)): identity on the flat layout.
    p_params[name_bot] = jnp.concatenate(pfs, axis=-1)          # (B, 4nf)
    z_prior[name_bot] = jnp.concatenate(samples, axis=-1)

    z_cn = z_bot if use_z else z_prior[name_bot]

    # ===== kernel 5: channel_norm s{n-1} + ResnetBlock s{n-1}_1 ==============
    k = prep["bot_tail"]
    cn, blk = k["cn"], k["blk"]
    (h,) = chain_call(
        {"x1": x_b1, "z": z_cn, "h": h},
        program=(
            ("gz", (("x1", cn["w1"], False), ("z", cn["w2"], False)), cn["b"], None),
            ("ap", (("gz", blk["w_pre"], True),), blk["b_pre"], None),
            ("h2", (("h", blk["w_cx"], True), ("ap", blk["w_ca"], True)),
             blk["b_cv"], "h"),
        ),
        out_names=("h2",))

    # ----------------- back to PyTorch NCHW at the jit boundary --------------
    h_out = flat_to_nchw(h, sp_bot, sp_bot, nf)
    p_params = {name_top: flat_to_nchw(p_params[name_top], 1, 1, nf),
                name_bot: flat_to_nchw(p_params[name_bot], sp_bot, sp_bot, nf)}
    z_prior = {name_top: flat_to_nchw(z_prior[name_top], 1, 1, nf),
               name_bot: flat_to_nchw(z_prior[name_bot], sp_bot, sp_bot, nf)}
    return h_out, p_params, z_prior


# ----------------------------- main -------------------------------------------

if __name__ == "__main__":
    n_stages, nf, B = 3, 8, 2
    key = jax.random.PRNGKey(0)
    kx = jax.random.split(key, 8)

    # deepest stage (s3) has 1x1 spatial, second bottleneck stage (s2) has 2x2
    x_e = {
        f"s{n_stages}_1": jax.random.normal(kx[0], (B, nf, 1, 1), jnp.float32),
        f"s{n_stages}_2": jax.random.normal(kx[1], (B, nf, 1, 1), jnp.float32),
        f"s{n_stages - 1}_1": jax.random.normal(kx[2], (B, nf, 2, 2), jnp.float32),
        f"s{n_stages - 1}_2": jax.random.normal(kx[3], (B, nf, 2, 2), jnp.float32),
    }
    z_post = {
        "1by1": jax.random.normal(kx[4], (B, nf, 1, 1), jnp.float32),
        "2by2": jax.random.normal(kx[5], (B, nf, 2, 2), jnp.float32),
    }
    params = build_params(kx[6], n_stages, nf)
    prep = prepare_params(params, n_stages, nf)

    fwd = jax.jit(vunet_bottleneck_forward, static_argnames=("n_stages", "mode"))
    h, p_params, z_prior = fwd(prep, x_e, z_post, kx[7],
                               n_stages=n_stages, mode="train")

    jax.block_until_ready(h)
    for v in p_params.values():
        jax.block_until_ready(v)
    for v in z_prior.values():
        jax.block_until_ready(v)

    assert h.shape == (B, nf, 2, 2)
    assert p_params["1by1"].shape == (B, nf, 1, 1)
    assert p_params["2by2"].shape == (B, nf, 2, 2)
    assert z_prior["1by1"].shape == (B, nf, 1, 1)
    assert z_prior["2by2"].shape == (B, nf, 2, 2)
    print("KERNEL_OK")
</pallas_src>

<mosaic_0001>
module attributes {stable_mosaic.version = 11 : i64} {
  func.func @_chain_kernel(%arg0: i32, %arg1: memref<2x32xf32, #tpu.memory_space<vmem>>, %arg2: memref<2x32xf32, #tpu.memory_space<vmem>>, %arg3: memref<32x32xbf16, #tpu.memory_space<vmem>>, %arg4: memref<32x32xbf16, #tpu.memory_space<vmem>>, %arg5: memref<32x32xbf16, #tpu.memory_space<vmem>>, %arg6: memref<32x32xbf16, #tpu.memory_space<vmem>>, %arg7: memref<32x8xbf16, #tpu.memory_space<vmem>>, %arg8: memref<1x32xf32, #tpu.memory_space<vmem>>, %arg9: memref<1x32xf32, #tpu.memory_space<vmem>>, %arg10: memref<1x32xf32, #tpu.memory_space<vmem>>, %arg11: memref<1x8xf32, #tpu.memory_space<vmem>>, %arg12: memref<2x32xf32, #tpu.memory_space<vmem>>, %arg13: memref<2x8xf32, #tpu.memory_space<vmem>>) attributes {dimension_semantics = [#tpu.dimension_semantics<parallel>], iteration_bounds = array<i64: 1>, scalar_prefetch = 0 : i64, scratch_operands = 0 : i64, tpu.core_type = #tpu.core_type<tc>, window_params = [{transform_indices = @transform_0, window_bounds = array<i64: 2, 32>}, {transform_indices = @transform_1, window_bounds = array<i64: 2, 32>}, {pipeline_mode = #tpu.pipeline_mode<synchronous>, transform_indices = @transform_2, window_bounds = array<i64: 32, 32>}, {pipeline_mode = #tpu.pipeline_mode<synchronous>, transform_indices = @transform_3, window_bounds = array<i64: 32, 32>}, {pipeline_mode = #tpu.pipeline_mode<synchronous>, transform_indices = @transform_4, window_bounds = array<i64: 32, 32>}, {pipeline_mode = #tpu.pipeline_mode<synchronous>, transform_indices = @transform_5, window_bounds = array<i64: 32, 32>}, {pipeline_mode = #tpu.pipeline_mode<synchronous>, transform_indices = @transform_6, window_bounds = array<i64: 32, 8>}, {pipeline_mode = #tpu.pipeline_mode<synchronous>, transform_indices = @transform_7, window_bounds = array<i64: 1, 32>}, {pipeline_mode = #tpu.pipeline_mode<synchronous>, transform_indices = @transform_8, window_bounds = array<i64: 1, 32>}, {pipeline_mode = #tpu.pipeline_mode<synchronous>, transform_indices = @transform_9, window_bounds = array<i64: 1, 32>}, {pipeline_mode = #tpu.pipeline_mode<synchronous>, transform_indices = @transform_10, window_bounds = array<i64: 1, 8>}, {transform_indices = @transform_11, window_bounds = array<i64: 2, 32>}, {transform_indices = @transform_12, window_bounds = array<i64: 2, 8>}]} {
    %c0 = arith.constant 0 : index
    %c0_0 = arith.constant 0 : index
    %0 = vector.load %arg1[%c0, %c0_0] : memref<2x32xf32, #tpu.memory_space<vmem>>, vector<2x32xf32>
    %c0_1 = arith.constant 0 : index
    %c0_2 = arith.constant 0 : index
    %1 = vector.load %arg2[%c0_1, %c0_2] : memref<2x32xf32, #tpu.memory_space<vmem>>, vector<2x32xf32>
    %cst = arith.constant 0.000000e+00 : f32
    %2 = vector.broadcast %cst : f32 to vector<2x32xf32>
    %3 = arith.cmpf oge, %1, %2 : vector<2x32xf32>
    %cst_3 = arith.constant 0.00999999977 : f32
    %4 = vector.broadcast %cst_3 : f32 to vector<2x32xf32>
    %5 = arith.mulf %4, %1 : vector<2x32xf32>
    %6 = arith.select %3, %1, %5 : vector<2x32xi1>, vector<2x32xf32>
    %7 = arith.truncf %6 : vector<2x32xf32> to vector<2x32xbf16>
    %c0_4 = arith.constant 0 : index
    %c0_5 = arith.constant 0 : index
    %8 = vector.load %arg3[%c0_4, %c0_5] : memref<32x32xbf16, #tpu.memory_space<vmem>>, vector<32x32xbf16>
    %cst_6 = arith.constant dense<0.000000e+00> : vector<2x32xf32>
    %9 = tpu.matmul %7, %8, %cst_6 {dimension_numbers = #tpu.dot_dimension_numbers<[1], [0], [0], [1], [0, 0, 1, 1], [], []>} : vector<2x32xbf16>, vector<32x32xbf16>, vector<2x32xf32> -> vector<2x32xf32>
    %c0_7 = arith.constant 0 : index
    %c0_8 = arith.constant 0 : index
    %10 = vector.load %arg8[%c0_7, %c0_8] : memref<1x32xf32, #tpu.memory_space<vmem>>, vector<1x32xf32>
    %11 = vector.broadcast %10 : vector<1x32xf32> to vector<2x32xf32>
    %12 = arith.addf %9, %11 : vector<2x32xf32>
    %cst_9 = arith.constant 0.000000e+00 : f32
    %13 = vector.broadcast %cst_9 : f32 to vector<2x32xf32>
    %14 = arith.cmpf oge, %0, %13 : vector<2x32xf32>
    %cst_10 = arith.constant 0.00999999977 : f32
    %15 = vector.broadcast %cst_10 : f32 to vector<2x32xf32>
    %16 = arith.mulf %15, %0 : vector<2x32xf32>
    %17 = arith.select %14, %0, %16 : vector<2x32xi1>, vector<2x32xf32>
    %18 = arith.truncf %17 : vector<2x32xf32> to vector<2x32xbf16>
    %c0_11 = arith.constant 0 : index
    %c0_12 = arith.constant 0 : index
    %19 = vector.load %arg4[%c0_11, %c0_12] : memref<32x32xbf16, #tpu.memory_space<vmem>>, vector<32x32xbf16>
    %cst_13 = arith.constant dense<0.000000e+00> : vector<2x32xf32>
    %20 = tpu.matmul %18, %19, %cst_13 {dimension_numbers = #tpu.dot_dimension_numbers<[1], [0], [0], [1], [0, 0, 1, 1], [], []>} : vector<2x32xbf16>, vector<32x32xbf16>, vector<2x32xf32> -> vector<2x32xf32>
    %cst_14 = arith.constant 0.000000e+00 : f32
    %21 = vector.broadcast %cst_14 : f32 to vector<2x32xf32>
    %22 = arith.cmpf oge, %12, %21 : vector<2x32xf32>
    %cst_15 = arith.constant 0.00999999977 : f32
    %23 = vector.broadcast %cst_15 : f32 to vector<2x32xf32>
    %24 = arith.mulf %23, %12 : vector<2x32xf32>
    %25 = arith.select %22, %12, %24 : vector<2x32xi1>, vector<2x32xf32>
    %26 = arith.truncf %25 : vector<2x32xf32> to vector<2x32xbf16>
    %c0_16 = arith.constant 0 : index
    %c0_17 = arith.constant 0 : index
    %27 = vector.load %arg5[%c0_16, %c0_17] : memref<32x32xbf16, #tpu.memory_space<vmem>>, vector<32x32xbf16>
    %cst_18 = arith.constant dense<0.000000e+00> : vector<2x32xf32>
    %28 = tpu.matmul %26, %27, %cst_18 {dimension_numbers = #tpu.dot_dimension_numbers<[1], [0], [0], [1], [0, 0, 1, 1], [], []>} : vector<2x32xbf16>, vector<32x32xbf16>, vector<2x32xf32> -> vector<2x32xf32>
    %29 = arith.addf %20, %28 : vector<2x32xf32>
    %c0_19 = arith.constant 0 : index
    %c0_20 = arith.constant 0 : index
    %30 = vector.load %arg9[%c0_19, %c0_20] : memref<1x32xf32, #tpu.memory_space<vmem>>, vector<1x32xf32>
    %31 = vector.broadcast %30 : vector<1x32xf32> to vector<2x32xf32>
    %32 = arith.addf %29, %31 : vector<2x32xf32>
    %33 = arith.addf %32, %0 : vector<2x32xf32>
    %cst_21 = arith.constant 0.000000e+00 : f32
    %34 = vector.broadcast %cst_21 : f32 to vector<2x32xf32>
    %35 = arith.cmpf oge, %33, %34 : vector<2x32xf32>
    %cst_22 = arith.constant 0.00999999977 : f32
    %36 = vector.broadcast %cst_22 : f32 to vector<2x32xf32>
    %37 = arith.mulf %36, %33 : vector<2x32xf32>
    %38 = arith.select %35, %33, %37 : vector<2x32xi1>, vector<2x32xf32>
    %39 = arith.truncf %38 : vector<2x32xf32> to vector<2x32xbf16>
    %c0_23 = arith.constant 0 : index
    %c0_24 = arith.constant 0 : index
    %40 = vector.load %arg6[%c0_23, %c0_24] : memref<32x32xbf16, #tpu.memory_space<vmem>>, vector<32x32xbf16>
    %cst_25 = arith.constant dense<0.000000e+00> : vector<2x32xf32>
    %41 = tpu.matmul %39, %40, %cst_25 {dimension_numbers = #tpu.dot_dimension_numbers<[1], [0], [0], [1], [0, 0, 1, 1], [], []>} : vector<2x32xbf16>, vector<32x32xbf16>, vector<2x32xf32> -> vector<2x32xf32>
    %c0_26 = arith.constant 0 : index
    %c0_27 = arith.constant 0 : index
    %42 = vector.load %arg10[%c0_26, %c0_27] : memref<1x32xf32, #tpu.memory_space<vmem>>, vector<1x32xf32>
    %43 = vector.broadcast %42 : vector<1x32xf32> to vector<2x32xf32>
    %44 = arith.addf %41, %43 : vector<2x32xf32>
    %45 = arith.addf %44, %33 : vector<2x32xf32>
    %46 = arith.truncf %45 : vector<2x32xf32> to vector<2x32xbf16>
    %c0_28 = arith.constant 0 : index
    %c0_29 = arith.constant 0 : index
    %47 = vector.load %arg7[%c0_28, %c0_29] : memref<32x8xbf16, #tpu.memory_space<vmem>>, vector<32x8xbf16>
    %cst_30 = arith.constant dense<0.000000e+00> : vector<2x8xf32>
    %48 = tpu.matmul %46, %47, %cst_30 {dimension_numbers = #tpu.dot_dimension_numbers<[1], [0], [0], [1], [0, 0, 1, 1], [], []>} : vector<2x32xbf16>, vector<32x8xbf16>, vector<2x8xf32> -> vector<2x8xf32>
    %c0_31 = arith.constant 0 : index
    %c0_32 = arith.constant 0 : index
    %49 = vector.load %arg11[%c0_31, %c0_32] : memref<1x8xf32, #tpu.memory_space<vmem>>, vector<1x8xf32>
    %50 = vector.broadcast %49 : vector<1x8xf32> to vector<2x8xf32>
    %51 = arith.addf %48, %50 : vector<2x8xf32>
    %c0_33 = arith.constant 0 : index
    %c0_34 = arith.constant 0 : index
    %52 = vector.load %arg12[%c0_33, %c0_34] : memref<2x32xf32, #tpu.memory_space<vmem>>, vector<2x32xf32>
    tpu.vector_store %arg12[%c0_33, %c0_34], %33 {strides = array<i32>} : memref<2x32xf32, #tpu.memory_space<vmem>>, vector<2x32xf32>,
    %c0_35 = arith.constant 0 : index
    %c0_36 = arith.constant 0 : index
    %53 = vector.load %arg13[%c0_35, %c0_36] : memref<2x8xf32, #tpu.memory_space<vmem>>, vector<2x8xf32>
    tpu.vector_store %arg13[%c0_35, %c0_36], %51 {strides = array<i32>} : memref<2x8xf32, #tpu.memory_space<vmem>>, vector<2x8xf32>,
    return
  }
  func.func @transform_0(%arg0: i32) -> (i32, i32) {
    %c0_i32 = arith.constant 0 : i32
    %c0_i32_0 = arith.constant 0 : i32
    return %arg0, %c0_i32 : i32, i32
  }
  func.func @transform_1(%arg0: i32) -> (i32, i32) {
    %c0_i32 = arith.constant 0 : i32
    %c0_i32_0 = arith.constant 0 : i32
    return %arg0, %c0_i32 : i32, i32
  }
  func.func @transform_2(%arg0: i32) -> (i32, i32) {
    %c0_i32 = arith.constant 0 : i32
    %c0_i32_0 = arith.constant 0 : i32
    %c0_i32_1 = arith.constant 0 : i32
    return %c0_i32, %c0_i32_0 : i32, i32
  }
  func.func @transform_3(%arg0: i32) -> (i32, i32) {
    %c0_i32 = arith.constant 0 : i32
    %c0_i32_0 = arith.constant 0 : i32
    %c0_i32_1 = arith.constant 0 : i32
    return %c0_i32, %c0_i32_0 : i32, i32
  }
  func.func @transform_4(%arg0: i32) -> (i32, i32) {
    %c0_i32 = arith.constant 0 : i32
    %c0_i32_0 = arith.constant 0 : i32
    %c0_i32_1 = arith.constant 0 : i32
    return %c0_i32, %c0_i32_0 : i32, i32
  }
  func.func @transform_5(%arg0: i32) -> (i32, i32) {
    %c0_i32 = arith.constant 0 : i32
    %c0_i32_0 = arith.constant 0 : i32
    %c0_i32_1 = arith.constant 0 : i32
    return %c0_i32, %c0_i32_0 : i32, i32
  }
  func.func @transform_6(%arg0: i32) -> (i32, i32) {
    %c0_i32 = arith.constant 0 : i32
    %c0_i32_0 = arith.constant 0 : i32
    %c0_i32_1 = arith.constant 0 : i32
    return %c0_i32, %c0_i32_0 : i32, i32
  }
  func.func @transform_7(%arg0: i32) -> (i32, i32) {
    %c0_i32 = arith.constant 0 : i32
    %c0_i32_0 = arith.constant 0 : i32
    %c0_i32_1 = arith.constant 0 : i32
    return %c0_i32, %c0_i32_0 : i32, i32
  }
  func.func @transform_8(%arg0: i32) -> (i32, i32) {
    %c0_i32 = arith.constant 0 : i32
    %c0_i32_0 = arith.constant 0 : i32
    %c0_i32_1 = arith.constant 0 : i32
    return %c0_i32, %c0_i32_0 : i32, i32
  }
  func.func @transform_9(%arg0: i32) -> (i32, i32) {
    %c0_i32 = arith.constant 0 : i32
    %c0_i32_0 = arith.constant 0 : i32
    %c0_i32_1 = arith.constant 0 : i32
    return %c0_i32, %c0_i32_0 : i32, i32
  }
  func.func @transform_10(%arg0: i32) -> (i32, i32) {
    %c0_i32 = arith.constant 0 : i32
    %c0_i32_0 = arith.constant 0 : i32
    %c0_i32_1 = arith.constant 0 : i32
    return %c0_i32, %c0_i32_0 : i32, i32
  }
  func.func @transform_11(%arg0: i32) -> (i32, i32) {
    %c0_i32 = arith.constant 0 : i32
    %c0_i32_0 = arith.constant 0 : i32
    return %arg0, %c0_i32 : i32, i32
  }
  func.func @transform_12(%arg0: i32) -> (i32, i32) {
    %c0_i32 = arith.constant 0 : i32
    %c0_i32_0 = arith.constant 0 : i32
    return %arg0, %c0_i32 : i32, i32
  }
}

module attributes {stable_mosaic.version = 11 : i64} {
  func.func @_chain_kernel(%arg0: i32, %arg1: memref<2x8xf32, #tpu.memory_space<vmem>>, %arg2: memref<8x8xbf16, #tpu.memory_space<vmem>>, %arg3: memref<8x8xbf16, #tpu.memory_space<vmem>>, %arg4: memref<8x8xbf16, #tpu.memory_space<vmem>>, %arg5: memref<8x8xbf16, #tpu.memory_space<vmem>>, %arg6: memref<1x8xf32, #tpu.memory_space<vmem>>, %arg7: memref<1x8xf32, #tpu.memory_space<vmem>>, %arg8: memref<1x8xf32, #tpu.memory_space<vmem>>, %arg9: memref<2x8xf32, #tpu.memory_space<vmem>>) attributes {dimension_semantics = [#tpu.dimension_semantics<parallel>], iteration_bounds = array<i64: 1>, scalar_prefetch = 0 : i64, scratch_operands = 0 : i64, tpu.core_type = #tpu.core_type<tc>, window_params = [{transform_indices = @transform_0, window_bounds = array<i64: 2, 8>}, {pipeline_mode = #tpu.pipeline_mode<synchronous>, transform_indices = @transform_1, window_bounds = array<i64: 8, 8>}, {pipeline_mode = #tpu.pipeline_mode<synchronous>, transform_indices = @transform_2, window_bounds = array<i64: 8, 8>}, {pipeline_mode = #tpu.pipeline_mode<synchronous>, transform_indices = @transform_3, window_bounds = array<i64: 8, 8>}, {pipeline_mode = #tpu.pipeline_mode<synchronous>, transform_indices = @transform_4, window_bounds = array<i64: 8, 8>}, {pipeline_mode = #tpu.pipeline_mode<synchronous>, transform_indices = @transform_5, window_bounds = array<i64: 1, 8>}, {pipeline_mode = #tpu.pipeline_mode<synchronous>, transform_indices = @transform_6, window_bounds = array<i64: 1, 8>}, {pipeline_mode = #tpu.pipeline_mode<synchronous>, transform_indices = @transform_7, window_bounds = array<i64: 1, 8>}, {transform_indices = @transform_8, window_bounds = array<i64: 2, 8>}]} {
    %c0 = arith.constant 0 : index
    %c0_0 = arith.constant 0 : index
    %0 = vector.load %arg1[%c0, %c0_0] : memref<2x8xf32, #tpu.memory_space<vmem>>, vector<2x8xf32>
    %1 = arith.truncf %0 : vector<2x8xf32> to vector<2x8xbf16>
    %c0_1 = arith.constant 0 : index
    %c0_2 = arith.constant 0 : index
    %2 = vector.load %arg2[%c0_1, %c0_2] : memref<8x8xbf16, #tpu.memory_space<vmem>>, vector<8x8xbf16>
    %cst = arith.constant dense<0.000000e+00> : vector<2x8xf32>
    %3 = tpu.matmul %1, %2, %cst {dimension_numbers = #tpu.dot_dimension_numbers<[1], [0], [0], [1], [0, 0, 1, 1], [], []>} : vector<2x8xbf16>, vector<8x8xbf16>, vector<2x8xf32> -> vector<2x8xf32>
    %c0_3 = arith.constant 0 : index
    %c0_4 = arith.constant 0 : index
    %4 = vector.load %arg6[%c0_3, %c0_4] : memref<1x8xf32, #tpu.memory_space<vmem>>, vector<1x8xf32>
    %5 = vector.broadcast %4 : vector<1x8xf32> to vector<2x8xf32>
    %6 = arith.addf %3, %5 : vector<2x8xf32>
    %cst_5 = arith.constant 0.000000e+00 : f32
    %7 = vector.broadcast %cst_5 : f32 to vector<2x8xf32>
    %8 = arith.cmpf oge, %0, %7 : vector<2x8xf32>
    %cst_6 = arith.constant 0.00999999977 : f32
    %9 = vector.broadcast %cst_6 : f32 to vector<2x8xf32>
    %10 = arith.mulf %9, %0 : vector<2x8xf32>
    %11 = arith.select %8, %0, %10 : vector<2x8xi1>, vector<2x8xf32>
    %12 = arith.truncf %11 : vector<2x8xf32> to vector<2x8xbf16>
    %c0_7 = arith.constant 0 : index
    %c0_8 = arith.constant 0 : index
    %13 = vector.load %arg3[%c0_7, %c0_8] : memref<8x8xbf16, #tpu.memory_space<vmem>>, vector<8x8xbf16>
    %cst_9 = arith.constant dense<0.000000e+00> : vector<2x8xf32>
    %14 = tpu.matmul %12, %13, %cst_9 {dimension_numbers = #tpu.dot_dimension_numbers<[1], [0], [0], [1], [0, 0, 1, 1], [], []>} : vector<2x8xbf16>, vector<8x8xbf16>, vector<2x8xf32> -> vector<2x8xf32>
    %c0_10 = arith.constant 0 : index
    %c0_11 = arith.constant 0 : index
    %15 = vector.load %arg7[%c0_10, %c0_11] : memref<1x8xf32, #tpu.memory_space<vmem>>, vector<1x8xf32>
    %16 = vector.broadcast %15 : vector<1x8xf32> to vector<2x8xf32>
    %17 = arith.addf %14, %16 : vector<2x8xf32>
    %cst_12 = arith.constant 0.000000e+00 : f32
    %18 = vector.broadcast %cst_12 : f32 to vector<2x8xf32>
    %19 = arith.cmpf oge, %6, %18 : vector<2x8xf32>
    %cst_13 = arith.constant 0.00999999977 : f32
    %20 = vector.broadcast %cst_13 : f32 to vector<2x8xf32>
    %21 = arith.mulf %20, %6 : vector<2x8xf32>
    %22 = arith.select %19, %6, %21 : vector<2x8xi1>, vector<2x8xf32>
    %23 = arith.truncf %22 : vector<2x8xf32> to vector<2x8xbf16>
    %c0_14 = arith.constant 0 : index
    %c0_15 = arith.constant 0 : index
    %24 = vector.load %arg4[%c0_14, %c0_15] : memref<8x8xbf16, #tpu.memory_space<vmem>>, vector<8x8xbf16>
    %cst_16 = arith.constant dense<0.000000e+00> : vector<2x8xf32>
    %25 = tpu.matmul %23, %24, %cst_16 {dimension_numbers = #tpu.dot_dimension_numbers<[1], [0], [0], [1], [0, 0, 1, 1], [], []>} : vector<2x8xbf16>, vector<8x8xbf16>, vector<2x8xf32> -> vector<2x8xf32>
    %cst_17 = arith.constant 0.000000e+00 : f32
    %26 = vector.broadcast %cst_17 : f32 to vector<2x8xf32>
    %27 = arith.cmpf oge, %17, %26 : vector<2x8xf32>
    %cst_18 = arith.constant 0.00999999977 : f32
    %28 = vector.broadcast %cst_18 : f32 to vector<2x8xf32>
    %29 = arith.mulf %28, %17 : vector<2x8xf32>
    %30 = arith.select %27, %17, %29 : vector<2x8xi1>, vector<2x8xf32>
    %31 = arith.truncf %30 : vector<2x8xf32> to vector<2x8xbf16>
    %c0_19 = arith.constant 0 : index
    %c0_20 = arith.constant 0 : index
    %32 = vector.load %arg5[%c0_19, %c0_20] : memref<8x8xbf16, #tpu.memory_space<vmem>>, vector<8x8xbf16>
    %cst_21 = arith.constant dense<0.000000e+00> : vector<2x8xf32>
    %33 = tpu.matmul %31, %32, %cst_21 {dimension_numbers = #tpu.dot_dimension_numbers<[1], [0], [0], [1], [0, 0, 1, 1], [], []>} : vector<2x8xbf16>, vector<8x8xbf16>, vector<2x8xf32> -> vector<2x8xf32>
    %34 = arith.addf %25, %33 : vector<2x8xf32>
    %c0_22 = arith.constant 0 : index
    %c0_23 = arith.constant 0 : index
    %35 = vector.load %arg8[%c0_22, %c0_23] : memref<1x8xf32, #tpu.memory_space<vmem>>, vector<1x8xf32>
    %36 = vector.broadcast %35 : vector<1x8xf32> to vector<2x8xf32>
    %37 = arith.addf %34, %36 : vector<2x8xf32>
    %38 = arith.addf %37, %6 : vector<2x8xf32>
    %c0_24 = arith.constant 0 : index
    %c0_25 = arith.constant 0 : index
    %39 = vector.load %arg9[%c0_24, %c0_25] : memref<2x8xf32, #tpu.memory_space<vmem>>, vector<2x8xf32>
    tpu.vector_store %arg9[%c0_24, %c0_25], %38 {strides = array<i32>} : memref<2x8xf32, #tpu.memory_space<vmem>>, vector<2x8xf32>,
    return
  }
  func.func @transform_0(%arg0: i32) -> (i32, i32) {
    %c0_i32 = arith.constant 0 : i32
    %c0_i32_0 = arith.constant 0 : i32
    return %arg0, %c0_i32 : i32, i32
  }
  func.func @transform_1(%arg0: i32) -> (i32, i32) {
    %c0_i32 = arith.constant 0 : i32
    %c0_i32_0 = arith.constant 0 : i32
    %c0_i32_1 = arith.constant 0 : i32
    return %c0_i32, %c0_i32_0 : i32, i32
  }
  func.func @transform_2(%arg0: i32) -> (i32, i32) {
    %c0_i32 = arith.constant 0 : i32
    %c0_i32_0 = arith.constant 0 : i32
    %c0_i32_1 = arith.constant 0 : i32
    return %c0_i32, %c0_i32_0 : i32, i32
  }
  func.func @transform_3(%arg0: i32) -> (i32, i32) {
    %c0_i32 = arith.constant 0 : i32
    %c0_i32_0 = arith.constant 0 : i32
    %c0_i32_1 = arith.constant 0 : i32
    return %c0_i32, %c0_i32_0 : i32, i32
  }
  func.func @transform_4(%arg0: i32) -> (i32, i32) {
    %c0_i32 = arith.constant 0 : i32
    %c0_i32_0 = arith.constant 0 : i32
    %c0_i32_1 = arith.constant 0 : i32
    return %c0_i32, %c0_i32_0 : i32, i32
  }
  func.func @transform_5(%arg0: i32) -> (i32, i32) {
    %c0_i32 = arith.constant 0 : i32
    %c0_i32_0 = arith.constant 0 : i32
    %c0_i32_1 = arith.constant 0 : i32
    return %c0_i32, %c0_i32_0 : i32, i32
  }
  func.func @transform_6(%arg0: i32) -> (i32, i32) {
    %c0_i32 = arith.constant 0 : i32
    %c0_i32_0 = arith.constant 0 : i32
    %c0_i32_1 = arith.constant 0 : i32
    return %c0_i32, %c0_i32_0 : i32, i32
  }
  func.func @transform_7(%arg0: i32) -> (i32, i32) {
    %c0_i32 = arith.constant 0 : i32
    %c0_i32_0 = arith.constant 0 : i32
    %c0_i32_1 = arith.constant 0 : i32
    return %c0_i32, %c0_i32_0 : i32, i32
  }
  func.func @transform_8(%arg0: i32) -> (i32, i32) {
    %c0_i32 = arith.constant 0 : i32
    %c0_i32_0 = arith.constant 0 : i32
    return %arg0, %c0_i32 : i32, i32
  }
}

module attributes {stable_mosaic.version = 11 : i64} {
  func.func @_chain_kernel(%arg0: i32, %arg1: memref<2x8xf32, #tpu.memory_space<vmem>>, %arg2: memref<2x8xf32, #tpu.memory_space<vmem>>, %arg3: memref<2x8xf32, #tpu.memory_space<vmem>>, %arg4: memref<8x8xbf16, #tpu.memory_space<vmem>>, %arg5: memref<8x8xbf16, #tpu.memory_space<vmem>>, %arg6: memref<8x8xbf16, #tpu.memory_space<vmem>>, %arg7: memref<8x8xbf16, #tpu.memory_space<vmem>>, %arg8: memref<8x8xbf16, #tpu.memory_space<vmem>>, %arg9: memref<8x32xbf16, #tpu.memory_space<vmem>>, %arg10: memref<1x8xf32, #tpu.memory_space<vmem>>, %arg11: memref<1x8xf32, #tpu.memory_space<vmem>>, %arg12: memref<1x8xf32, #tpu.memory_space<vmem>>, %arg13: memref<1x32xf32, #tpu.memory_space<vmem>>, %arg14: memref<2x32xf32, #tpu.memory_space<vmem>>) attributes {dimension_semantics = [#tpu.dimension_semantics<parallel>], iteration_bounds = array<i64: 1>, scalar_prefetch = 0 : i64, scratch_operands = 0 : i64, tpu.core_type = #tpu.core_type<tc>, window_params = [{transform_indices = @transform_0, window_bounds = array<i64: 2, 8>}, {transform_indices = @transform_1, window_bounds = array<i64: 2, 8>}, {transform_indices = @transform_2, window_bounds = array<i64: 2, 8>}, {pipeline_mode = #tpu.pipeline_mode<synchronous>, transform_indices = @transform_3, window_bounds = array<i64: 8, 8>}, {pipeline_mode = #tpu.pipeline_mode<synchronous>, transform_indices = @transform_4, window_bounds = array<i64: 8, 8>}, {pipeline_mode = #tpu.pipeline_mode<synchronous>, transform_indices = @transform_5, window_bounds = array<i64: 8, 8>}, {pipeline_mode = #tpu.pipeline_mode<synchronous>, transform_indices = @transform_6, window_bounds = array<i64: 8, 8>}, {pipeline_mode = #tpu.pipeline_mode<synchronous>, transform_indices = @transform_7, window_bounds = array<i64: 8, 8>}, {pipeline_mode = #tpu.pipeline_mode<synchronous>, transform_indices = @transform_8, window_bounds = array<i64: 8, 32>}, {pipeline_mode = #tpu.pipeline_mode<synchronous>, transform_indices = @transform_9, window_bounds = array<i64: 1, 8>}, {pipeline_mode = #tpu.pipeline_mode<synchronous>, transform_indices = @transform_10, window_bounds = array<i64: 1, 8>}, {pipeline_mode = #tpu.pipeline_mode<synchronous>, transform_indices = @transform_11, window_bounds = array<i64: 1, 8>}, {pipeline_mode = #tpu.pipeline_mode<synchronous>, transform_indices = @transform_12, window_bounds = array<i64: 1, 32>}, {transform_indices = @transform_13, window_bounds = array<i64: 2, 32>}]} {
    %c0 = arith.constant 0 : index
    %c0_0 = arith.constant 0 : index
    %0 = vector.load %arg1[%c0, %c0_0] : memref<2x8xf32, #tpu.memory_space<vmem>>, vector<2x8xf32>
    %c0_1 = arith.constant 0 : index
    %c0_2 = arith.constant 0 : index
    %1 = vector.load %arg2[%c0_1, %c0_2] : memref<2x8xf32, #tpu.memory_space<vmem>>, vector<2x8xf32>
    %c0_3 = arith.constant 0 : index
    %c0_4 = arith.constant 0 : index
    %2 = vector.load %arg3[%c0_3, %c0_4] : memref<2x8xf32, #tpu.memory_space<vmem>>, vector<2x8xf32>
    %3 = arith.truncf %0 : vector<2x8xf32> to vector<2x8xbf16>
    %c0_5 = arith.constant 0 : index
    %c0_6 = arith.constant 0 : index
    %4 = vector.load %arg4[%c0_5, %c0_6] : memref<8x8xbf16, #tpu.memory_space<vmem>>, vector<8x8xbf16>
    %cst = arith.constant dense<0.000000e+00> : vector<2x8xf32>
    %5 = tpu.matmul %3, %4, %cst {dimension_numbers = #tpu.dot_dimension_numbers<[1], [0], [0], [1], [0, 0, 1, 1], [], []>} : vector<2x8xbf16>, vector<8x8xbf16>, vector<2x8xf32> -> vector<2x8xf32>
    %6 = arith.truncf %1 : vector<2x8xf32> to vector<2x8xbf16>
    %c0_7 = arith.constant 0 : index
    %c0_8 = arith.constant 0 : index
    %7 = vector.load %arg5[%c0_7, %c0_8] : memref<8x8xbf16, #tpu.memory_space<vmem>>, vector<8x8xbf16>
    %cst_9 = arith.constant dense<0.000000e+00> : vector<2x8xf32>
    %8 = tpu.matmul %6, %7, %cst_9 {dimension_numbers = #tpu.dot_dimension_numbers<[1], [0], [0], [1], [0, 0, 1, 1], [], []>} : vector<2x8xbf16>, vector<8x8xbf16>, vector<2x8xf32> -> vector<2x8xf32>
    %9 = arith.addf %5, %8 : vector<2x8xf32>
    %c0_10 = arith.constant 0 : index
    %c0_11 = arith.constant 0 : index
    %10 = vector.load %arg10[%c0_10, %c0_11] : memref<1x8xf32, #tpu.memory_space<vmem>>, vector<1x8xf32>
    %11 = vector.broadcast %10 : vector<1x8xf32> to vector<2x8xf32>
    %12 = arith.addf %9, %11 : vector<2x8xf32>
    %cst_12 = arith.constant 0.000000e+00 : f32
    %13 = vector.broadcast %cst_12 : f32 to vector<2x8xf32>
    %14 = arith.cmpf oge, %12, %13 : vector<2x8xf32>
    %cst_13 = arith.constant 0.00999999977 : f32
    %15 = vector.broadcast %cst_13 : f32 to vector<2x8xf32>
    %16 = arith.mulf %15, %12 : vector<2x8xf32>
    %17 = arith.select %14, %12, %16 : vector<2x8xi1>, vector<2x8xf32>
    %18 = arith.truncf %17 : vector<2x8xf32> to vector<2x8xbf16>
    %c0_14 = arith.constant 0 : index
    %c0_15 = arith.constant 0 : index
    %19 = vector.load %arg6[%c0_14, %c0_15] : memref<8x8xbf16, #tpu.memory_space<vmem>>, vector<8x8xbf16>
    %cst_16 = arith.constant dense<0.000000e+00> : vector<2x8xf32>
    %20 = tpu.matmul %18, %19, %cst_16 {dimension_numbers = #tpu.dot_dimension_numbers<[1], [0], [0], [1], [0, 0, 1, 1], [], []>} : vector<2x8xbf16>, vector<8x8xbf16>, vector<2x8xf32> -> vector<2x8xf32>
    %c0_17 = arith.constant 0 : index
    %c0_18 = arith.constant 0 : index
    %21 = vector.load %arg11[%c0_17, %c0_18] : memref<1x8xf32, #tpu.memory_space<vmem>>, vector<1x8xf32>
    %22 = vector.broadcast %21 : vector<1x8xf32> to vector<2x8xf32>
    %23 = arith.addf %20, %22 : vector<2x8xf32>
    %cst_19 = arith.constant 0.000000e+00 : f32
    %24 = vector.broadcast %cst_19 : f32 to vector<2x8xf32>
    %25 = arith.cmpf oge, %2, %24 : vector<2x8xf32>
    %cst_20 = arith.constant 0.00999999977 : f32
    %26 = vector.broadcast %cst_20 : f32 to vector<2x8xf32>
    %27 = arith.mulf %26, %2 : vector<2x8xf32>
    %28 = arith.select %25, %2, %27 : vector<2x8xi1>, vector<2x8xf32>
    %29 = arith.truncf %28 : vector<2x8xf32> to vector<2x8xbf16>
    %c0_21 = arith.constant 0 : index
    %c0_22 = arith.constant 0 : index
    %30 = vector.load %arg7[%c0_21, %c0_22] : memref<8x8xbf16, #tpu.memory_space<vmem>>, vector<8x8xbf16>
    %cst_23 = arith.constant dense<0.000000e+00> : vector<2x8xf32>
    %31 = tpu.matmul %29, %30, %cst_23 {dimension_numbers = #tpu.dot_dimension_numbers<[1], [0], [0], [1], [0, 0, 1, 1], [], []>} : vector<2x8xbf16>, vector<8x8xbf16>, vector<2x8xf32> -> vector<2x8xf32>
    %cst_24 = arith.constant 0.000000e+00 : f32
    %32 = vector.broadcast %cst_24 : f32 to vector<2x8xf32>
    %33 = arith.cmpf oge, %23, %32 : vector<2x8xf32>
    %cst_25 = arith.constant 0.00999999977 : f32
    %34 = vector.broadcast %cst_25 : f32 to vector<2x8xf32>
    %35 = arith.mulf %34, %23 : vector<2x8xf32>
    %36 = arith.select %33, %23, %35 : vector<2x8xi1>, vector<2x8xf32>
    %37 = arith.truncf %36 : vector<2x8xf32> to vector<2x8xbf16>
    %c0_26 = arith.constant 0 : index
    %c0_27 = arith.constant 0 : index
    %38 = vector.load %arg8[%c0_26, %c0_27] : memref<8x8xbf16, #tpu.memory_space<vmem>>, vector<8x8xbf16>
    %cst_28 = arith.constant dense<0.000000e+00> : vector<2x8xf32>
    %39 = tpu.matmul %37, %38, %cst_28 {dimension_numbers = #tpu.dot_dimension_numbers<[1], [0], [0], [1], [0, 0, 1, 1], [], []>} : vector<2x8xbf16>, vector<8x8xbf16>, vector<2x8xf32> -> vector<2x8xf32>
    %40 = arith.addf %31, %39 : vector<2x8xf32>
    %c0_29 = arith.constant 0 : index
    %c0_30 = arith.constant 0 : index
    %41 = vector.load %arg12[%c0_29, %c0_30] : memref<1x8xf32, #tpu.memory_space<vmem>>, vector<1x8xf32>
    %42 = vector.broadcast %41 : vector<1x8xf32> to vector<2x8xf32>
    %43 = arith.addf %40, %42 : vector<2x8xf32>
    %44 = arith.addf %43, %2 : vector<2x8xf32>
    %45 = arith.truncf %44 : vector<2x8xf32> to vector<2x8xbf16>
    %c0_31 = arith.constant 0 : index
    %c0_32 = arith.constant 0 : index
    %46 = vector.load %arg9[%c0_31, %c0_32] : memref<8x32xbf16, #tpu.memory_space<vmem>>, vector<8x32xbf16>
    %cst_33 = arith.constant dense<0.000000e+00> : vector<2x32xf32>
    %47 = tpu.matmul %45, %46, %cst_33 {dimension_numbers = #tpu.dot_dimension_numbers<[1], [0], [0], [1], [0, 0, 1, 1], [], []>} : vector<2x8xbf16>, vector<8x32xbf16>, vector<2x32xf32> -> vector<2x32xf32>
    %c0_34 = arith.constant 0 : index
    %c0_35 = arith.constant 0 : index
    %48 = vector.load %arg13[%c0_34, %c0_35] : memref<1x32xf32, #tpu.memory_space<vmem>>, vector<1x32xf32>
    %49 = vector.broadcast %48 : vector<1x32xf32> to vector<2x32xf32>
    %50 = arith.addf %47, %49 : vector<2x32xf32>
    %c0_36 = arith.constant 0 : index
    %c0_37 = arith.constant 0 : index
    %51 = vector.load %arg14[%c0_36, %c0_37] : memref<2x32xf32, #tpu.memory_space<vmem>>, vector<2x32xf32>
    tpu.vector_store %arg14[%c0_36, %c0_37], %50 {strides = array<i32>} : memref<2x32xf32, #tpu.memory_space<vmem>>, vector<2x32xf32>,
    return
  }
  func.func @transform_0(%arg0: i32) -> (i32, i32) {
    %c0_i32 = arith.constant 0 : i32
    %c0_i32_0 = arith.constant 0 : i32
    return %arg0, %c0_i32 : i32, i32
  }
  func.func @transform_1(%arg0: i32) -> (i32, i32) {
    %c0_i32 = arith.constant 0 : i32
    %c0_i32_0 = arith.constant 0 : i32
    return %arg0, %c0_i32 : i32, i32
  }
  func.func @transform_2(%arg0: i32) -> (i32, i32) {
    %c0_i32 = arith.constant 0 : i32
    %c0_i32_0 = arith.constant 0 : i32
    return %arg0, %c0_i32 : i32, i32
  }
  func.func @transform_3(%arg0: i32) -> (i32, i32) {
    %c0_i32 = arith.constant 0 : i32
    %c0_i32_0 = arith.constant 0 : i32
    %c0_i32_1 = arith.constant 0 : i32
    return %c0_i32, %c0_i32_0 : i32, i32
  }
  func.func @transform_4(%arg0: i32) -> (i32, i32) {
    %c0_i32 = arith.constant 0 : i32
    %c0_i32_0 = arith.constant 0 : i32
    %c0_i32_1 = arith.constant 0 : i32
    return %c0_i32, %c0_i32_0 : i32, i32
  }
  func.func @transform_5(%arg0: i32) -> (i32, i32) {
    %c0_i32 = arith.constant 0 : i32
    %c0_i32_0 = arith.constant 0 : i32
    %c0_i32_1 = arith.constant 0 : i32
    return %c0_i32, %c0_i32_0 : i32, i32
  }
  func.func @transform_6(%arg0: i32) -> (i32, i32) {
    %c0_i32 = arith.constant 0 : i32
    %c0_i32_0 = arith.constant 0 : i32
    %c0_i32_1 = arith.constant 0 : i32
    return %c0_i32, %c0_i32_0 : i32, i32
  }
  func.func @transform_7(%arg0: i32) -> (i32, i32) {
    %c0_i32 = arith.constant 0 : i32
    %c0_i32_0 = arith.constant 0 : i32
    %c0_i32_1 = arith.constant 0 : i32
    return %c0_i32, %c0_i32_0 : i32, i32
  }
  func.func @transform_8(%arg0: i32) -> (i32, i32) {
    %c0_i32 = arith.constant 0 : i32
    %c0_i32_0 = arith.constant 0 : i32
    %c0_i32_1 = arith.constant 0 : i32
    return %c0_i32, %c0_i32_0 : i32, i32
  }
  func.func @transform_9(%arg0: i32) -> (i32, i32) {
    %c0_i32 = arith.constant 0 : i32
    %c0_i32_0 = arith.constant 0 : i32
    %c0_i32_1 = arith.constant 0 : i32
    return %c0_i32, %c0_i32_0 : i32, i32
  }
  func.func @transform_10(%arg0: i32) -> (i32, i32) {
    %c0_i32 = arith.constant 0 : i32
    %c0_i32_0 = arith.constant 0 : i32
    %c0_i32_1 = arith.constant 0 : i32
    return %c0_i32, %c0_i32_0 : i32, i32
  }
  func.func @transform_11(%arg0: i32) -> (i32, i32) {
    %c0_i32 = arith.constant 0 : i32
    %c0_i32_0 = arith.constant 0 : i32
    %c0_i32_1 = arith.constant 0 : i32
    return %c0_i32, %c0_i32_0 : i32, i32
  }
  func.func @transform_12(%arg0: i32) -> (i32, i32) {
    %c0_i32 = arith.constant 0 : i32
    %c0_i32_0 = arith.constant 0 : i32
    %c0_i32_1 = arith.constant 0 : i32
    return %c0_i32, %c0_i32_0 : i32, i32
  }
  func.func @transform_13(%arg0: i32) -> (i32, i32) {
    %c0_i32 = arith.constant 0 : i32
    %c0_i32_0 = arith.constant 0 : i32
    return %arg0, %c0_i32 : i32, i32
  }
}

module attributes {stable_mosaic.version = 11 : i64} {
  func.func @_chain_kernel(%arg0: i32, %arg1: memref<2x8xf32, #tpu.memory_space<vmem>>, %arg2: memref<2x8xf32, #tpu.memory_space<vmem>>, %arg3: memref<2x8xf32, #tpu.memory_space<vmem>>, %arg4: memref<2x8xf32, #tpu.memory_space<vmem>>, %arg5: memref<8x8xbf16, #tpu.memory_space<vmem>>, %arg6: memref<8x8xbf16, #tpu.memory_space<vmem>>, %arg7: memref<8x8xbf16, #tpu.memory_space<vmem>>, %arg8: memref<8x8xbf16, #tpu.memory_space<vmem>>, %arg9: memref<8x8xbf16, #tpu.memory_space<vmem>>, %arg10: memref<8x8xbf16, #tpu.memory_space<vmem>>, %arg11: memref<8x8xbf16, #tpu.memory_space<vmem>>, %arg12: memref<8x8xbf16, #tpu.memory_space<vmem>>, %arg13: memref<8x8xbf16, #tpu.memory_space<vmem>>, %arg14: memref<1x8xf32, #tpu.memory_space<vmem>>, %arg15: memref<1x8xf32, #tpu.memory_space<vmem>>, %arg16: memref<1x8xf32, #tpu.memory_space<vmem>>, %arg17: memref<1x8xf32, #tpu.memory_space<vmem>>, %arg18: memref<1x8xf32, #tpu.memory_space<vmem>>, %arg19: memref<1x8xf32, #tpu.memory_space<vmem>>, %arg20: memref<2x8xf32, #tpu.memory_space<vmem>>, %arg21: memref<2x8xf32, #tpu.memory_space<vmem>>, %arg22: memref<2x8xf32, #tpu.memory_space<vmem>>) attributes {dimension_semantics = [#tpu.dimension_semantics<parallel>], iteration_bounds = array<i64: 1>, scalar_prefetch = 0 : i64, scratch_operands = 0 : i64, tpu.core_type = #tpu.core_type<tc>, window_params = [{transform_indices = @transform_0, window_bounds = array<i64: 2, 8>}, {transform_indices = @transform_1, window_bounds = array<i64: 2, 8>}, {transform_indices = @transform_2, window_bounds = array<i64: 2, 8>}, {transform_indices = @transform_3, window_bounds = array<i64: 2, 8>}, {pipeline_mode = #tpu.pipeline_mode<synchronous>, transform_indices = @transform_4, window_bounds = array<i64: 8, 8>}, {pipeline_mode = #tpu.pipeline_mode<synchronous>, transform_indices = @transform_5, window_bounds = array<i64: 8, 8>}, {pipeline_mode = #tpu.pipeline_mode<synchronous>, transform_indices = @transform_6, window_bounds = array<i64: 8, 8>}, {pipeline_mode = #tpu.pipeline_mode<synchronous>, transform_indices = @transform_7, window_bounds = array<i64: 8, 8>}, {pipeline_mode = #tpu.pipeline_mode<synchronous>, transform_indices = @transform_8, window_bounds = array<i64: 8, 8>}, {pipeline_mode = #tpu.pipeline_mode<synchronous>, transform_indices = @transform_9, window_bounds = array<i64: 8, 8>}, {pipeline_mode = #tpu.pipeline_mode<synchronous>, transform_indices = @transform_10, window_bounds = array<i64: 8, 8>}, {pipeline_mode = #tpu.pipeline_mode<synchronous>, transform_indices = @transform_11, window_bounds = array<i64: 8, 8>}, {pipeline_mode = #tpu.pipeline_mode<synchronous>, transform_indices = @transform_12, window_bounds = array<i64: 8, 8>}, {pipeline_mode = #tpu.pipeline_mode<synchronous>, transform_indices = @transform_13, window_bounds = array<i64: 1, 8>}, {pipeline_mode = #tpu.pipeline_mode<synchronous>, transform_indices = @transform_14, window_bounds = array<i64: 1, 8>}, {pipeline_mode = #tpu.pipeline_mode<synchronous>, transform_indices = @transform_15, window_bounds = array<i64: 1, 8>}, {pipeline_mode = #tpu.pipeline_mode<synchronous>, transform_indices = @transform_16, window_bounds = array<i64: 1, 8>}, {pipeline_mode = #tpu.pipeline_mode<synchronous>, transform_indices = @transform_17, window_bounds = array<i64: 1, 8>}, {pipeline_mode = #tpu.pipeline_mode<synchronous>, transform_indices = @transform_18, window_bounds = array<i64: 1, 8>}, {transform_indices = @transform_19, window_bounds = array<i64: 2, 8>}, {transform_indices = @transform_20, window_bounds = array<i64: 2, 8>}, {transform_indices = @transform_21, window_bounds = array<i64: 2, 8>}]} {
    %c0 = arith.constant 0 : index
    %c0_0 = arith.constant 0 : index
    %0 = vector.load %arg1[%c0, %c0_0] : memref<2x8xf32, #tpu.memory_space<vmem>>, vector<2x8xf32>
    %c0_1 = arith.constant 0 : index
    %c0_2 = arith.constant 0 : index
    %1 = vector.load %arg2[%c0_1, %c0_2] : memref<2x8xf32, #tpu.memory_space<vmem>>, vector<2x8xf32>
    %c0_3 = arith.constant 0 : index
    %c0_4 = arith.constant 0 : index
    %2 = vector.load %arg3[%c0_3, %c0_4] : memref<2x8xf32, #tpu.memory_space<vmem>>, vector<2x8xf32>
    %c0_5 = arith.constant 0 : index
    %c0_6 = arith.constant 0 : index
    %3 = vector.load %arg4[%c0_5, %c0_6] : memref<2x8xf32, #tpu.memory_space<vmem>>, vector<2x8xf32>
    %cst = arith.constant 0.000000e+00 : f32
    %4 = vector.broadcast %cst : f32 to vector<2x8xf32>
    %5 = arith.cmpf oge, %1, %4 : vector<2x8xf32>
    %cst_7 = arith.constant 0.00999999977 : f32
    %6 = vector.broadcast %cst_7 : f32 to vector<2x8xf32>
    %7 = arith.mulf %6, %1 : vector<2x8xf32>
    %8 = arith.select %5, %1, %7 : vector<2x8xi1>, vector<2x8xf32>
    %9 = arith.truncf %8 : vector<2x8xf32> to vector<2x8xbf16>
    %c0_8 = arith.constant 0 : index
    %c0_9 = arith.constant 0 : index
    %10 = vector.load %arg5[%c0_8, %c0_9] : memref<8x8xbf16, #tpu.memory_space<vmem>>, vector<8x8xbf16>
    %cst_10 = arith.constant dense<0.000000e+00> : vector<2x8xf32>
    %11 = tpu.matmul %9, %10, %cst_10 {dimension_numbers = #tpu.dot_dimension_numbers<[1], [0], [0], [1], [0, 0, 1, 1], [], []>} : vector<2x8xbf16>, vector<8x8xbf16>, vector<2x8xf32> -> vector<2x8xf32>
    %c0_11 = arith.constant 0 : index
    %c0_12 = arith.constant 0 : index
    %12 = vector.load %arg14[%c0_11, %c0_12] : memref<1x8xf32, #tpu.memory_space<vmem>>, vector<1x8xf32>
    %13 = vector.broadcast %12 : vector<1x8xf32> to vector<2x8xf32>
    %14 = arith.addf %11, %13 : vector<2x8xf32>
    %cst_13 = arith.constant 0.000000e+00 : f32
    %15 = vector.broadcast %cst_13 : f32 to vector<2x8xf32>
    %16 = arith.cmpf oge, %0, %15 : vector<2x8xf32>
    %cst_14 = arith.constant 0.00999999977 : f32
    %17 = vector.broadcast %cst_14 : f32 to vector<2x8xf32>
    %18 = arith.mulf %17, %0 : vector<2x8xf32>
    %19 = arith.select %16, %0, %18 : vector<2x8xi1>, vector<2x8xf32>
    %20 = arith.truncf %19 : vector<2x8xf32> to vector<2x8xbf16>
    %c0_15 = arith.constant 0 : index
    %c0_16 = arith.constant 0 : index
    %21 = vector.load %arg6[%c0_15, %c0_16] : memref<8x8xbf16, #tpu.memory_space<vmem>>, vector<8x8xbf16>
    %cst_17 = arith.constant dense<0.000000e+00> : vector<2x8xf32>
    %22 = tpu.matmul %20, %21, %cst_17 {dimension_numbers = #tpu.dot_dimension_numbers<[1], [0], [0], [1], [0, 0, 1, 1], [], []>} : vector<2x8xbf16>, vector<8x8xbf16>, vector<2x8xf32> -> vector<2x8xf32>
    %cst_18 = arith.constant 0.000000e+00 : f32
    %23 = vector.broadcast %cst_18 : f32 to vector<2x8xf32>
    %24 = arith.cmpf oge, %14, %23 : vector<2x8xf32>
    %cst_19 = arith.constant 0.00999999977 : f32
    %25 = vector.broadcast %cst_19 : f32 to vector<2x8xf32>
    %26 = arith.mulf %25, %14 : vector<2x8xf32>
    %27 = arith.select %24, %14, %26 : vector<2x8xi1>, vector<2x8xf32>
    %28 = arith.truncf %27 : vector<2x8xf32> to vector<2x8xbf16>
    %c0_20 = arith.constant 0 : index
    %c0_21 = arith.constant 0 : index
    %29 = vector.load %arg7[%c0_20, %c0_21] : memref<8x8xbf16, #tpu.memory_space<vmem>>, vector<8x8xbf16>
    %cst_22 = arith.constant dense<0.000000e+00> : vector<2x8xf32>
    %30 = tpu.matmul %28, %29, %cst_22 {dimension_numbers = #tpu.dot_dimension_numbers<[1], [0], [0], [1], [0, 0, 1, 1], [], []>} : vector<2x8xbf16>, vector<8x8xbf16>, vector<2x8xf32> -> vector<2x8xf32>
    %31 = arith.addf %22, %30 : vector<2x8xf32>
    %c0_23 = arith.constant 0 : index
    %c0_24 = arith.constant 0 : index
    %32 = vector.load %arg15[%c0_23, %c0_24] : memref<1x8xf32, #tpu.memory_space<vmem>>, vector<1x8xf32>
    %33 = vector.broadcast %32 : vector<1x8xf32> to vector<2x8xf32>
    %34 = arith.addf %31, %33 : vector<2x8xf32>
    %35 = arith.addf %34, %0 : vector<2x8xf32>
    %cst_25 = arith.constant 0.000000e+00 : f32
    %36 = vector.broadcast %cst_25 : f32 to vector<2x8xf32>
    %37 = arith.cmpf oge, %2, %36 : vector<2x8xf32>
    %cst_26 = arith.constant 0.00999999977 : f32
    %38 = vector.broadcast %cst_26 : f32 to vector<2x8xf32>
    %39 = arith.mulf %38, %2 : vector<2x8xf32>
    %40 = arith.select %37, %2, %39 : vector<2x8xi1>, vector<2x8xf32>
    %41 = arith.truncf %40 : vector<2x8xf32> to vector<2x8xbf16>
    %c0_27 = arith.constant 0 : index
    %c0_28 = arith.constant 0 : index
    %42 = vector.load %arg8[%c0_27, %c0_28] : memref<8x8xbf16, #tpu.memory_space<vmem>>, vector<8x8xbf16>
    %cst_29 = arith.constant dense<0.000000e+00> : vector<2x8xf32>
    %43 = tpu.matmul %41, %42, %cst_29 {dimension_numbers = #tpu.dot_dimension_numbers<[1], [0], [0], [1], [0, 0, 1, 1], [], []>} : vector<2x8xbf16>, vector<8x8xbf16>, vector<2x8xf32> -> vector<2x8xf32>
    %c0_30 = arith.constant 0 : index
    %c0_31 = arith.constant 0 : index
    %44 = vector.load %arg16[%c0_30, %c0_31] : memref<1x8xf32, #tpu.memory_space<vmem>>, vector<1x8xf32>
    %45 = vector.broadcast %44 : vector<1x8xf32> to vector<2x8xf32>
    %46 = arith.addf %43, %45 : vector<2x8xf32>
    %cst_32 = arith.constant 0.000000e+00 : f32
    %47 = vector.broadcast %cst_32 : f32 to vector<2x8xf32>
    %48 = arith.cmpf oge, %35, %47 : vector<2x8xf32>
    %cst_33 = arith.constant 0.00999999977 : f32
    %49 = vector.broadcast %cst_33 : f32 to vector<2x8xf32>
    %50 = arith.mulf %49, %35 : vector<2x8xf32>
    %51 = arith.select %48, %35, %50 : vector<2x8xi1>, vector<2x8xf32>
    %52 = arith.truncf %51 : vector<2x8xf32> to vector<2x8xbf16>
    %c0_34 = arith.constant 0 : index
    %c0_35 = arith.constant 0 : index
    %53 = vector.load %arg9[%c0_34, %c0_35] : memref<8x8xbf16, #tpu.memory_space<vmem>>, vector<8x8xbf16>
    %cst_36 = arith.constant dense<0.000000e+00> : vector<2x8xf32>
    %54 = tpu.matmul %52, %53, %cst_36 {dimension_numbers = #tpu.dot_dimension_numbers<[1], [0], [0], [1], [0, 0, 1, 1], [], []>} : vector<2x8xbf16>, vector<8x8xbf16>, vector<2x8xf32> -> vector<2x8xf32>
    %cst_37 = arith.constant 0.000000e+00 : f32
    %55 = vector.broadcast %cst_37 : f32 to vector<2x8xf32>
    %56 = arith.cmpf oge, %46, %55 : vector<2x8xf32>
    %cst_38 = arith.constant 0.00999999977 : f32
    %57 = vector.broadcast %cst_38 : f32 to vector<2x8xf32>
    %58 = arith.mulf %57, %46 : vector<2x8xf32>
    %59 = arith.select %56, %46, %58 : vector<2x8xi1>, vector<2x8xf32>
    %60 = arith.truncf %59 : vector<2x8xf32> to vector<2x8xbf16>
    %c0_39 = arith.constant 0 : index
    %c0_40 = arith.constant 0 : index
    %61 = vector.load %arg10[%c0_39, %c0_40] : memref<8x8xbf16, #tpu.memory_space<vmem>>, vector<8x8xbf16>
    %cst_41 = arith.constant dense<0.000000e+00> : vector<2x8xf32>
    %62 = tpu.matmul %60, %61, %cst_41 {dimension_numbers = #tpu.dot_dimension_numbers<[1], [0], [0], [1], [0, 0, 1, 1], [], []>} : vector<2x8xbf16>, vector<8x8xbf16>, vector<2x8xf32> -> vector<2x8xf32>
    %63 = arith.addf %54, %62 : vector<2x8xf32>
    %c0_42 = arith.constant 0 : index
    %c0_43 = arith.constant 0 : index
    %64 = vector.load %arg17[%c0_42, %c0_43] : memref<1x8xf32, #tpu.memory_space<vmem>>, vector<1x8xf32>
    %65 = vector.broadcast %64 : vector<1x8xf32> to vector<2x8xf32>
    %66 = arith.addf %63, %65 : vector<2x8xf32>
    %67 = arith.addf %66, %35 : vector<2x8xf32>
    %cst_44 = arith.constant 0.000000e+00 : f32
    %68 = vector.broadcast %cst_44 : f32 to vector<2x8xf32>
    %69 = arith.cmpf oge, %3, %68 : vector<2x8xf32>
    %cst_45 = arith.constant 0.00999999977 : f32
    %70 = vector.broadcast %cst_45 : f32 to vector<2x8xf32>
    %71 = arith.mulf %70, %3 : vector<2x8xf32>
    %72 = arith.select %69, %3, %71 : vector<2x8xi1>, vector<2x8xf32>
    %73 = arith.truncf %72 : vector<2x8xf32> to vector<2x8xbf16>
    %c0_46 = arith.constant 0 : index
    %c0_47 = arith.constant 0 : index
    %74 = vector.load %arg11[%c0_46, %c0_47] : memref<8x8xbf16, #tpu.memory_space<vmem>>, vector<8x8xbf16>
    %cst_48 = arith.constant dense<0.000000e+00> : vector<2x8xf32>
    %75 = tpu.matmul %73, %74, %cst_48 {dimension_numbers = #tpu.dot_dimension_numbers<[1], [0], [0], [1], [0, 0, 1, 1], [], []>} : vector<2x8xbf16>, vector<8x8xbf16>, vector<2x8xf32> -> vector<2x8xf32>
    %c0_49 = arith.constant 0 : index
    %c0_50 = arith.constant 0 : index
    %76 = vector.load %arg18[%c0_49, %c0_50] : memref<1x8xf32, #tpu.memory_space<vmem>>, vector<1x8xf32>
    %77 = vector.broadcast %76 : vector<1x8xf32> to vector<2x8xf32>
    %78 = arith.addf %75, %77 : vector<2x8xf32>
    %cst_51 = arith.constant 0.000000e+00 : f32
    %79 = vector.broadcast %cst_51 : f32 to vector<2x8xf32>
    %80 = arith.cmpf oge, %67, %79 : vector<2x8xf32>
    %cst_52 = arith.constant 0.00999999977 : f32
    %81 = vector.broadcast %cst_52 : f32 to vector<2x8xf32>
    %82 = arith.mulf %81, %67 : vector<2x8xf32>
    %83 = arith.select %80, %67, %82 : vector<2x8xi1>, vector<2x8xf32>
    %84 = arith.truncf %83 : vector<2x8xf32> to vector<2x8xbf16>
    %c0_53 = arith.constant 0 : index
    %c0_54 = arith.constant 0 : index
    %85 = vector.load %arg12[%c0_53, %c0_54] : memref<8x8xbf16, #tpu.memory_space<vmem>>, vector<8x8xbf16>
    %cst_55 = arith.constant dense<0.000000e+00> : vector<2x8xf32>
    %86 = tpu.matmul %84, %85, %cst_55 {dimension_numbers = #tpu.dot_dimension_numbers<[1], [0], [0], [1], [0, 0, 1, 1], [], []>} : vector<2x8xbf16>, vector<8x8xbf16>, vector<2x8xf32> -> vector<2x8xf32>
    %cst_56 = arith.constant 0.000000e+00 : f32
    %87 = vector.broadcast %cst_56 : f32 to vector<2x8xf32>
    %88 = arith.cmpf oge, %78, %87 : vector<2x8xf32>
    %cst_57 = arith.constant 0.00999999977 : f32
    %89 = vector.broadcast %cst_57 : f32 to vector<2x8xf32>
    %90 = arith.mulf %89, %78 : vector<2x8xf32>
    %91 = arith.select %88, %78, %90 : vector<2x8xi1>, vector<2x8xf32>
    %92 = arith.truncf %91 : vector<2x8xf32> to vector<2x8xbf16>
    %c0_58 = arith.constant 0 : index
    %c0_59 = arith.constant 0 : index
    %93 = vector.load %arg13[%c0_58, %c0_59] : memref<8x8xbf16, #tpu.memory_space<vmem>>, vector<8x8xbf16>
    %cst_60 = arith.constant dense<0.000000e+00> : vector<2x8xf32>
    %94 = tpu.matmul %92, %93, %cst_60 {dimension_numbers = #tpu.dot_dimension_numbers<[1], [0], [0], [1], [0, 0, 1, 1], [], []>} : vector<2x8xbf16>, vector<8x8xbf16>, vector<2x8xf32> -> vector<2x8xf32>
    %95 = arith.addf %86, %94 : vector<2x8xf32>
    %c0_61 = arith.constant 0 : index
    %c0_62 = arith.constant 0 : index
    %96 = vector.load %arg19[%c0_61, %c0_62] : memref<1x8xf32, #tpu.memory_space<vmem>>, vector<1x8xf32>
    %97 = vector.broadcast %96 : vector<1x8xf32> to vector<2x8xf32>
    %98 = arith.addf %95, %97 : vector<2x8xf32>
    %99 = arith.addf %98, %67 : vector<2x8xf32>
    %c0_63 = arith.constant 0 : index
    %c0_64 = arith.constant 0 : index
    %100 = vector.load %arg20[%c0_63, %c0_64] : memref<2x8xf32, #tpu.memory_space<vmem>>, vector<2x8xf32>
    tpu.vector_store %arg20[%c0_63, %c0_64], %35 {strides = array<i32>} : memref<2x8xf32, #tpu.memory_space<vmem>>, vector<2x8xf32>,
    %c0_65 = arith.constant 0 : index
    %c0_66 = arith.constant 0 : index
    %101 = vector.load %arg21[%c0_65, %c0_66] : memref<2x8xf32, #tpu.memory_space<vmem>>, vector<2x8xf32>
    tpu.vector_store %arg21[%c0_65, %c0_66], %67 {strides = array<i32>} : memref<2x8xf32, #tpu.memory_space<vmem>>, vector<2x8xf32>,
    %c0_67 = arith.constant 0 : index
    %c0_68 = arith.constant 0 : index
    %102 = vector.load %arg22[%c0_67, %c0_68] : memref<2x8xf32, #tpu.memory_space<vmem>>, vector<2x8xf32>
    tpu.vector_store %arg22[%c0_67, %c0_68], %99 {strides = array<i32>} : memref<2x8xf32, #tpu.memory_space<vmem>>, vector<2x8xf32>,
    return
  }
  func.func @transform_0(%arg0: i32) -> (i32, i32) {
    %c0_i32 = arith.constant 0 : i32
    %c0_i32_0 = arith.constant 0 : i32
    return %arg0, %c0_i32 : i32, i32
  }
  func.func @transform_1(%arg0: i32) -> (i32, i32) {
    %c0_i32 = arith.constant 0 : i32
    %c0_i32_0 = arith.constant 0 : i32
    return %arg0, %c0_i32 : i32, i32
  }
  func.func @transform_2(%arg0: i32) -> (i32, i32) {
    %c0_i32 = arith.constant 0 : i32
    %c0_i32_0 = arith.constant 0 : i32
    return %arg0, %c0_i32 : i32, i32
  }
  func.func @transform_3(%arg0: i32) -> (i32, i32) {
    %c0_i32 = arith.constant 0 : i32
    %c0_i32_0 = arith.constant 0 : i32
    return %arg0, %c0_i32 : i32, i32
  }
  func.func @transform_4(%arg0: i32) -> (i32, i32) {
    %c0_i32 = arith.constant 0 : i32
    %c0_i32_0 = arith.constant 0 : i32
    %c0_i32_1 = arith.constant 0 : i32
    return %c0_i32, %c0_i32_0 : i32, i32
  }
  func.func @transform_5(%arg0: i32) -> (i32, i32) {
    %c0_i32 = arith.constant 0 : i32
    %c0_i32_0 = arith.constant 0 : i32
    %c0_i32_1 = arith.constant 0 : i32
    return %c0_i32, %c0_i32_0 : i32, i32
  }
  func.func @transform_6(%arg0: i32) -> (i32, i32) {
    %c0_i32 = arith.constant 0 : i32
    %c0_i32_0 = arith.constant 0 : i32
    %c0_i32_1 = arith.constant 0 : i32
    return %c0_i32, %c0_i32_0 : i32, i32
  }
  func.func @transform_7(%arg0: i32) -> (i32, i32) {
    %c0_i32 = arith.constant 0 : i32
    %c0_i32_0 = arith.constant 0 : i32
    %c0_i32_1 = arith.constant 0 : i32
    return %c0_i32, %c0_i32_0 : i32, i32
  }
  func.func @transform_8(%arg0: i32) -> (i32, i32) {
    %c0_i32 = arith.constant 0 : i32
    %c0_i32_0 = arith.constant 0 : i32
    %c0_i32_1 = arith.constant 0 : i32
    return %c0_i32, %c0_i32_0 : i32, i32
  }
  func.func @transform_9(%arg0: i32) -> (i32, i32) {
    %c0_i32 = arith.constant 0 : i32
    %c0_i32_0 = arith.constant 0 : i32
    %c0_i32_1 = arith.constant 0 : i32
    return %c0_i32, %c0_i32_0 : i32, i32
  }
  func.func @transform_10(%arg0: i32) -> (i32, i32) {
    %c0_i32 = arith.constant 0 : i32
    %c0_i32_0 = arith.constant 0 : i32
    %c0_i32_1 = arith.constant 0 : i32
    return %c0_i32, %c0_i32_0 : i32, i32
  }
  func.func @transform_11(%arg0: i32) -> (i32, i32) {
    %c0_i32 = arith.constant 0 : i32
    %c0_i32_0 = arith.constant 0 : i32
    %c0_i32_1 = arith.constant 0 : i32
    return %c0_i32, %c0_i32_0 : i32, i32
  }
  func.func @transform_12(%arg0: i32) -> (i32, i32) {
    %c0_i32 = arith.constant 0 : i32
    %c0_i32_0 = arith.constant 0 : i32
    %c0_i32_1 = arith.constant 0 : i32
    return %c0_i32, %c0_i32_0 : i32, i32
  }
  func.func @transform_13(%arg0: i32) -> (i32, i32) {
    %c0_i32 = arith.constant 0 : i32
    %c0_i32_0 = arith.constant 0 : i32
    %c0_i32_1 = arith.constant 0 : i32
    return %c0_i32, %c0_i32_0 : i32, i32
  }
  func.func @transform_14(%arg0: i32) -> (i32, i32) {
    %c0_i32 = arith.constant 0 : i32
    %c0_i32_0 = arith.constant 0 : i32
    %c0_i32_1 = arith.constant 0 : i32
    return %c0_i32, %c0_i32_0 : i32, i32
  }
  func.func @transform_15(%arg0: i32) -> (i32, i32) {
    %c0_i32 = arith.constant 0 : i32
    %c0_i32_0 = arith.constant 0 : i32
    %c0_i32_1 = arith.constant 0 : i32
    return %c0_i32, %c0_i32_0 : i32, i32
  }
  func.func @transform_16(%arg0: i32) -> (i32, i32) {
    %c0_i32 = arith.constant 0 : i32
    %c0_i32_0 = arith.constant 0 : i32
    %c0_i32_1 = arith.constant 0 : i32
    return %c0_i32, %c0_i32_0 : i32, i32
  }
  func.func @transform_17(%arg0: i32) -> (i32, i32) {
    %c0_i32 = arith.constant 0 : i32
    %c0_i32_0 = arith.constant 0 : i32
    %c0_i32_1 = arith.constant 0 : i32
    return %c0_i32, %c0_i32_0 : i32, i32
  }
  func.func @transform_18(%arg0: i32) -> (i32, i32) {
    %c0_i32 = arith.constant 0 : i32
    %c0_i32_0 = arith.constant 0 : i32
    %c0_i32_1 = arith.constant 0 : i32
    return %c0_i32, %c0_i32_0 : i32, i32
  }
  func.func @transform_19(%arg0: i32) -> (i32, i32) {
    %c0_i32 = arith.constant 0 : i32
    %c0_i32_0 = arith.constant 0 : i32
    return %arg0, %c0_i32 : i32, i32
  }
  func.func @transform_20(%arg0: i32) -> (i32, i32) {
    %c0_i32 = arith.constant 0 : i32
    %c0_i32_0 = arith.constant 0 : i32
    return %arg0, %c0_i32 : i32, i32
  }
  func.func @transform_21(%arg0: i32) -> (i32, i32) {
    %c0_i32 = arith.constant 0 : i32
    %c0_i32_0 = arith.constant 0 : i32
    return %arg0, %c0_i32 : i32, i32
  }
}

module attributes {stable_mosaic.version = 11 : i64} {
  func.func @_chain_kernel(%arg0: i32, %arg1: memref<2x32xf32, #tpu.memory_space<vmem>>, %arg2: memref<2x32xf32, #tpu.memory_space<vmem>>, %arg3: memref<2x32xf32, #tpu.memory_space<vmem>>, %arg4: memref<32x32xbf16, #tpu.memory_space<vmem>>, %arg5: memref<32x32xbf16, #tpu.memory_space<vmem>>, %arg6: memref<32x32xbf16, #tpu.memory_space<vmem>>, %arg7: memref<32x32xbf16, #tpu.memory_space<vmem>>, %arg8: memref<32x32xbf16, #tpu.memory_space<vmem>>, %arg9: memref<1x32xf32, #tpu.memory_space<vmem>>, %arg10: memref<1x32xf32, #tpu.memory_space<vmem>>, %arg11: memref<1x32xf32, #tpu.memory_space<vmem>>, %arg12: memref<2x32xf32, #tpu.memory_space<vmem>>) attributes {dimension_semantics = [#tpu.dimension_semantics<parallel>], iteration_bounds = array<i64: 1>, scalar_prefetch = 0 : i64, scratch_operands = 0 : i64, tpu.core_type = #tpu.core_type<tc>, window_params = [{transform_indices = @transform_0, window_bounds = array<i64: 2, 32>}, {transform_indices = @transform_1, window_bounds = array<i64: 2, 32>}, {transform_indices = @transform_2, window_bounds = array<i64: 2, 32>}, {pipeline_mode = #tpu.pipeline_mode<synchronous>, transform_indices = @transform_3, window_bounds = array<i64: 32, 32>}, {pipeline_mode = #tpu.pipeline_mode<synchronous>, transform_indices = @transform_4, window_bounds = array<i64: 32, 32>}, {pipeline_mode = #tpu.pipeline_mode<synchronous>, transform_indices = @transform_5, window_bounds = array<i64: 32, 32>}, {pipeline_mode = #tpu.pipeline_mode<synchronous>, transform_indices = @transform_6, window_bounds = array<i64: 32, 32>}, {pipeline_mode = #tpu.pipeline_mode<synchronous>, transform_indices = @transform_7, window_bounds = array<i64: 32, 32>}, {pipeline_mode = #tpu.pipeline_mode<synchronous>, transform_indices = @transform_8, window_bounds = array<i64: 1, 32>}, {pipeline_mode = #tpu.pipeline_mode<synchronous>, transform_indices = @transform_9, window_bounds = array<i64: 1, 32>}, {pipeline_mode = #tpu.pipeline_mode<synchronous>, transform_indices = @transform_10, window_bounds = array<i64: 1, 32>}, {transform_indices = @transform_11, window_bounds = array<i64: 2, 32>}]} {
    %c0 = arith.constant 0 : index
    %c0_0 = arith.constant 0 : index
    %0 = vector.load %arg1[%c0, %c0_0] : memref<2x32xf32, #tpu.memory_space<vmem>>, vector<2x32xf32>
    %c0_1 = arith.constant 0 : index
    %c0_2 = arith.constant 0 : index
    %1 = vector.load %arg2[%c0_1, %c0_2] : memref<2x32xf32, #tpu.memory_space<vmem>>, vector<2x32xf32>
    %c0_3 = arith.constant 0 : index
    %c0_4 = arith.constant 0 : index
    %2 = vector.load %arg3[%c0_3, %c0_4] : memref<2x32xf32, #tpu.memory_space<vmem>>, vector<2x32xf32>
    %3 = arith.truncf %0 : vector<2x32xf32> to vector<2x32xbf16>
    %c0_5 = arith.constant 0 : index
    %c0_6 = arith.constant 0 : index
    %4 = vector.load %arg4[%c0_5, %c0_6] : memref<32x32xbf16, #tpu.memory_space<vmem>>, vector<32x32xbf16>
    %cst = arith.constant dense<0.000000e+00> : vector<2x32xf32>
    %5 = tpu.matmul %3, %4, %cst {dimension_numbers = #tpu.dot_dimension_numbers<[1], [0], [0], [1], [0, 0, 1, 1], [], []>} : vector<2x32xbf16>, vector<32x32xbf16>, vector<2x32xf32> -> vector<2x32xf32>
    %6 = arith.truncf %1 : vector<2x32xf32> to vector<2x32xbf16>
    %c0_7 = arith.constant 0 : index
    %c0_8 = arith.constant 0 : index
    %7 = vector.load %arg5[%c0_7, %c0_8] : memref<32x32xbf16, #tpu.memory_space<vmem>>, vector<32x32xbf16>
    %cst_9 = arith.constant dense<0.000000e+00> : vector<2x32xf32>
    %8 = tpu.matmul %6, %7, %cst_9 {dimension_numbers = #tpu.dot_dimension_numbers<[1], [0], [0], [1], [0, 0, 1, 1], [], []>} : vector<2x32xbf16>, vector<32x32xbf16>, vector<2x32xf32> -> vector<2x32xf32>
    %9 = arith.addf %5, %8 : vector<2x32xf32>
    %c0_10 = arith.constant 0 : index
    %c0_11 = arith.constant 0 : index
    %10 = vector.load %arg9[%c0_10, %c0_11] : memref<1x32xf32, #tpu.memory_space<vmem>>, vector<1x32xf32>
    %11 = vector.broadcast %10 : vector<1x32xf32> to vector<2x32xf32>
    %12 = arith.addf %9, %11 : vector<2x32xf32>
    %cst_12 = arith.constant 0.000000e+00 : f32
    %13 = vector.broadcast %cst_12 : f32 to vector<2x32xf32>
    %14 = arith.cmpf oge, %12, %13 : vector<2x32xf32>
    %cst_13 = arith.constant 0.00999999977 : f32
    %15 = vector.broadcast %cst_13 : f32 to vector<2x32xf32>
    %16 = arith.mulf %15, %12 : vector<2x32xf32>
    %17 = arith.select %14, %12, %16 : vector<2x32xi1>, vector<2x32xf32>
    %18 = arith.truncf %17 : vector<2x32xf32> to vector<2x32xbf16>
    %c0_14 = arith.constant 0 : index
    %c0_15 = arith.constant 0 : index
    %19 = vector.load %arg6[%c0_14, %c0_15] : memref<32x32xbf16, #tpu.memory_space<vmem>>, vector<32x32xbf16>
    %cst_16 = arith.constant dense<0.000000e+00> : vector<2x32xf32>
    %20 = tpu.matmul %18, %19, %cst_16 {dimension_numbers = #tpu.dot_dimension_numbers<[1], [0], [0], [1], [0, 0, 1, 1], [], []>} : vector<2x32xbf16>, vector<32x32xbf16>, vector<2x32xf32> -> vector<2x32xf32>
    %c0_17 = arith.constant 0 : index
    %c0_18 = arith.constant 0 : index
    %21 = vector.load %arg10[%c0_17, %c0_18] : memref<1x32xf32, #tpu.memory_space<vmem>>, vector<1x32xf32>
    %22 = vector.broadcast %21 : vector<1x32xf32> to vector<2x32xf32>
    %23 = arith.addf %20, %22 : vector<2x32xf32>
    %cst_19 = arith.constant 0.000000e+00 : f32
    %24 = vector.broadcast %cst_19 : f32 to vector<2x32xf32>
    %25 = arith.cmpf oge, %2, %24 : vector<2x32xf32>
    %cst_20 = arith.constant 0.00999999977 : f32
    %26 = vector.broadcast %cst_20 : f32 to vector<2x32xf32>
    %27 = arith.mulf %26, %2 : vector<2x32xf32>
    %28 = arith.select %25, %2, %27 : vector<2x32xi1>, vector<2x32xf32>
    %29 = arith.truncf %28 : vector<2x32xf32> to vector<2x32xbf16>
    %c0_21 = arith.constant 0 : index
    %c0_22 = arith.constant 0 : index
    %30 = vector.load %arg7[%c0_21, %c0_22] : memref<32x32xbf16, #tpu.memory_space<vmem>>, vector<32x32xbf16>
    %cst_23 = arith.constant dense<0.000000e+00> : vector<2x32xf32>
    %31 = tpu.matmul %29, %30, %cst_23 {dimension_numbers = #tpu.dot_dimension_numbers<[1], [0], [0], [1], [0, 0, 1, 1], [], []>} : vector<2x32xbf16>, vector<32x32xbf16>, vector<2x32xf32> -> vector<2x32xf32>
    %cst_24 = arith.constant 0.000000e+00 : f32
    %32 = vector.broadcast %cst_24 : f32 to vector<2x32xf32>
    %33 = arith.cmpf oge, %23, %32 : vector<2x32xf32>
    %cst_25 = arith.constant 0.00999999977 : f32
    %34 = vector.broadcast %cst_25 : f32 to vector<2x32xf32>
    %35 = arith.mulf %34, %23 : vector<2x32xf32>
    %36 = arith.select %33, %23, %35 : vector<2x32xi1>, vector<2x32xf32>
    %37 = arith.truncf %36 : vector<2x32xf32> to vector<2x32xbf16>
    %c0_26 = arith.constant 0 : index
    %c0_27 = arith.constant 0 : index
    %38 = vector.load %arg8[%c0_26, %c0_27] : memref<32x32xbf16, #tpu.memory_space<vmem>>, vector<32x32xbf16>
    %cst_28 = arith.constant dense<0.000000e+00> : vector<2x32xf32>
    %39 = tpu.matmul %37, %38, %cst_28 {dimension_numbers = #tpu.dot_dimension_numbers<[1], [0], [0], [1], [0, 0, 1, 1], [], []>} : vector<2x32xbf16>, vector<32x32xbf16>, vector<2x32xf32> -> vector<2x32xf32>
    %40 = arith.addf %31, %39 : vector<2x32xf32>
    %c0_29 = arith.constant 0 : index
    %c0_30 = arith.constant 0 : index
    %41 = vector.load %arg11[%c0_29, %c0_30] : memref<1x32xf32, #tpu.memory_space<vmem>>, vector<1x32xf32>
    %42 = vector.broadcast %41 : vector<1x32xf32> to vector<2x32xf32>
    %43 = arith.addf %40, %42 : vector<2x32xf32>
    %44 = arith.addf %43, %2 : vector<2x32xf32>
    %c0_31 = arith.constant 0 : index
    %c0_32 = arith.constant 0 : index
    %45 = vector.load %arg12[%c0_31, %c0_32] : memref<2x32xf32, #tpu.memory_space<vmem>>, vector<2x32xf32>
    tpu.vector_store %arg12[%c0_31, %c0_32], %44 {strides = array<i32>} : memref<2x32xf32, #tpu.memory_space<vmem>>, vector<2x32xf32>,
    return
  }
  func.func @transform_0(%arg0: i32) -> (i32, i32) {
    %c0_i32 = arith.constant 0 : i32
    %c0_i32_0 = arith.constant 0 : i32
    return %arg0, %c0_i32 : i32, i32
  }
  func.func @transform_1(%arg0: i32) -> (i32, i32) {
    %c0_i32 = arith.constant 0 : i32
    %c0_i32_0 = arith.constant 0 : i32
    return %arg0, %c0_i32 : i32, i32
  }
  func.func @transform_2(%arg0: i32) -> (i32, i32) {
    %c0_i32 = arith.constant 0 : i32
    %c0_i32_0 = arith.constant 0 : i32
    return %arg0, %c0_i32 : i32, i32
  }
  func.func @transform_3(%arg0: i32) -> (i32, i32) {
    %c0_i32 = arith.constant 0 : i32
    %c0_i32_0 = arith.constant 0 : i32
    %c0_i32_1 = arith.constant 0 : i32
    return %c0_i32, %c0_i32_0 : i32, i32
  }
  func.func @transform_4(%arg0: i32) -> (i32, i32) {
    %c0_i32 = arith.constant 0 : i32
    %c0_i32_0 = arith.constant 0 : i32
    %c0_i32_1 = arith.constant 0 : i32
    return %c0_i32, %c0_i32_0 : i32, i32
  }
  func.func @transform_5(%arg0: i32) -> (i32, i32) {
    %c0_i32 = arith.constant 0 : i32
    %c0_i32_0 = arith.constant 0 : i32
    %c0_i32_1 = arith.constant 0 : i32
    return %c0_i32, %c0_i32_0 : i32, i32
  }
  func.func @transform_6(%arg0: i32) -> (i32, i32) {
    %c0_i32 = arith.constant 0 : i32
    %c0_i32_0 = arith.constant 0 : i32
    %c0_i32_1 = arith.constant 0 : i32
    return %c0_i32, %c0_i32_0 : i32, i32
  }
  func.func @transform_7(%arg0: i32) -> (i32, i32) {
    %c0_i32 = arith.constant 0 : i32
    %c0_i32_0 = arith.constant 0 : i32
    %c0_i32_1 = arith.constant 0 : i32
    return %c0_i32, %c0_i32_0 : i32, i32
  }
  func.func @transform_8(%arg0: i32) -> (i32, i32) {
    %c0_i32 = arith.constant 0 : i32
    %c0_i32_0 = arith.constant 0 : i32
    %c0_i32_1 = arith.constant 0 : i32
    return %c0_i32, %c0_i32_0 : i32, i32
  }
  func.func @transform_9(%arg0: i32) -> (i32, i32) {
    %c0_i32 = arith.constant 0 : i32
    %c0_i32_0 = arith.constant 0 : i32
    %c0_i32_1 = arith.constant 0 : i32
    return %c0_i32, %c0_i32_0 : i32, i32
  }
  func.func @transform_10(%arg0: i32) -> (i32, i32) {
    %c0_i32 = arith.constant 0 : i32
    %c0_i32_0 = arith.constant 0 : i32
    %c0_i32_1 = arith.constant 0 : i32
    return %c0_i32, %c0_i32_0 : i32, i32
  }
  func.func @transform_11(%arg0: i32) -> (i32, i32) {
    %c0_i32 = arith.constant 0 : i32
    %c0_i32_0 = arith.constant 0 : i32
    return %arg0, %c0_i32 : i32, i32
  }
}

</mosaic_0001>

<bundles_post_ra>
// kernel: vunet_bottleneck_forward.5
= control target key start
LH: loop header
LB: loop body
LE: loop exit
PB: predicated region body
PF: predicated region fallthrough
CT: control target
= control target key end

     0   :  { %vm44_vm0 = vcmask 1043456   ;;  %v304_v0 = vmov 0.0   ;;  %vm305_vm1 = vmmov 0   ;;  %vm40_vm3 = vcmask 64512   ;;  %s390_s1 = inlined_call_operand.vmem [shape: bf16[8,8], index: 1, kind: input, shape index: {}]   ;;  %s391_s2 = inlined_call_operand.vmem [shape: bf16[8,8], index: 2, kind: input, shape index: {}]   ;;  %s392_s0 = inlined_call_operand.vmem [shape: f32[2,8], index: 0, kind: input, shape index: {}]   ;;  %s393_s3 = inlined_call_operand.vmem [shape: bf16[8,8], index: 3, kind: input, shape index: {}]   ;;  %s394_s4 = inlined_call_operand.vmem [shape: bf16[8,8], index: 4, kind: input, shape index: {}]   ;;  %s395_s5 = inlined_call_operand.vmem [shape: f32[1,8], index: 5, kind: input, shape index: {}]   ;;  %s396_s6 = inlined_call_operand.vmem [shape: f32[1,8], index: 6, kind: input, shape index: {}]   ;;  %s397_s7 = inlined_call_operand.vmem [shape: f32[1,8], index: 7, kind: input, shape index: {}]   ;;  %s398_s8 = inlined_call_operand.vmem [shape: f32[2,8], index: 8, kind: output, shape index: {}]  }
   0x1   :  { %278 = vmatprep.subr.bf16.mxu0 %v304_v0  ;;  %v32_v1 = vld [vmem:[%s390_s1] sm:$0xf]  ;;  %284 = vmatprep.subr.bf16.mxu1 %v304_v0  ;;  %vm257_vm6 = vcmask 58368  }
   0x2   :  { %v92_v2 = vld [vmem:[%s391_s2] sm:$0xf]  ;;  %v46_v4 = vsel %vm44_vm0, %v32_v1, 0  ;;  %280 = vmatprep.mubr.msk.bf16.mxu0 %vm305_vm1, %v304_v0  ;;  %286 = vmatprep.mubr.msk.bf16.mxu1 %vm305_vm1, %v304_v0 }
   0x3   :  { %v30_v3 = vld [vmem:[%s392_s0] sm:$0x3]  ;;  %v104_v5 = vsel %vm44_vm0, %v92_v2, 0  ;;  %279 = vmatpush3.bf16.msra.mxu0 %v46_v4 }
   0x4   :  { %v31_v6 = vpack.c.bf16 %v30_v3, %v30_v3  ;;  %vm88_vm2 = vcmp.ge.f32.partialorder %v30_v3, 0.0  ;;  %285 = vmatpush3.bf16.msra.mxu1 %v104_v5  ;;  %v89_v7 = vmul.f32 0.01, %v30_v3  ;;  %290 = vmatprep.subr.bf16.mxu0 %v304_v0  ;;  %v150_v10 = vld [vmem:[%s393_s3] sm:$0xf] }
   0x5   :  { %296 = vmatprep.subr.bf16.mxu1 %v304_v0  ;;  %v155_v11 = vld [vmem:[%s394_s4] sm:$0xf]  ;;  %v206_v12 = vsel %vm44_vm0, %v150_v10, 0 }
   0x6   :  { %v90_v8 = vsel %vm88_vm2, %v30_v3, %v89_v7  ;;  %281 = vmatmul.mubr.msk.bf16.vlgmr.msra.gmra.mxu0 %vm40_vm3, %v31_v6  ;;  %v160_v13 = vsel %vm44_vm0, %v155_v11, 0  ;;  %v263_v14 = vld [vmem:[%s395_s5] ss:$0 sm:$0xff] }
   0x7   :  { %v91_v9 = vpack.c.bf16 %v90_v8, %v90_v8  ;;  %292 = vmatprep.mubr.msk.bf16.mxu0 %vm305_vm1, %v304_v0  ;;  %291 = vmatpush3.bf16.msra.mxu0 %v160_v13  ;;  %v265_v16 = vld [vmem:[%s396_s6] ss:$0 sm:$0xff] }
   0x8   :  { %v269_v34 = vld [vmem:[%s397_s7] ss:$0 sm:$0xff] }
   0x9   :  { %287 = vmatmul.mubr.msk.bf16.vlgmr.msra.gmra.mxu1 %vm40_vm3, %v91_v9 }
   0xa   :  { %298 = vmatprep.mubr.msk.bf16.mxu1 %vm305_vm1, %v304_v0  ;;  %297 = vmatpush3.bf16.msra.mxu1 %v206_v12 }
  0xc6   :  { %v82_v15 = vpop.f32.mrf.mxu0 }
  0xc7   :  { %v83_v17 = vadd.f32 %v263_v14, %v82_v15 }
  0xc8   :  { %v282_v19 = vpop.f32.mrf.mxu0 }
  0xc9   :  { %v140_v18 = vpop.f32.mrf.mxu1  ;;  %vm146_vm4 = vcmp.ge.f32.partialorder %v83_v17, 0.0  ;;  %v147_v20 = vmul.f32 0.01, %v83_v17 }
  0xca   :  { %v141_v21 = vadd.f32 %v265_v16, %v140_v18  ;;  %v85_v23 = vpop.f32.mrf.mxu0 }
  0xcb   :  { %v288_v22 = vpop.f32.mrf.mxu1  ;;  %v148_v24 = vsel %vm146_vm4, %v83_v17, %v147_v20 }
  0xcc   :  { %vm151_vm5 = vcmp.ge.f32.partialorder %v141_v21, 0.0  ;;  %v152_v25 = vmul.f32 0.01, %v141_v21  ;;  %v149_v26 = vpack.c.bf16 %v148_v24, %v148_v24  ;;  %v283_v28 = vpop.f32.mrf.mxu0 }
  0xcd   :  { %v143_v27 = vpop.f32.mrf.mxu1 }
  0xce   :  { %v153_v29 = vsel %vm151_vm5, %v141_v21, %v152_v25  ;;  %299 = vmatmul.mubr.msk.bf16.vlgmr.msra.gmra.mxu1 %vm40_vm3, %v149_v26 }
  0xcf   :  { %v154_v30 = vpack.c.bf16 %v153_v29, %v153_v29  ;;  %v289_v31 = vpop.f32.mrf.mxu1 }
  0xd1   :  { %293 = vmatmul.mubr.msk.bf16.vlgmr.msra.gmra.mxu0 %vm40_vm3, %v154_v30 }
 0x18e   :  { %v242_v32 = vpop.f32.mrf.mxu1 }
 0x190   :  { %v300_v35 = vpop.f32.mrf.mxu1 }
 0x191   :  { %v196_v33 = vpop.f32.mrf.mxu0 }
 0x192   :  { %v243_v36 = vadd.f32 %v242_v32, %v196_v33  ;;  %v245_v38 = vpop.f32.mrf.mxu1 }
 0x193   :  { %v294_v37 = vpop.f32.mrf.mxu0 }
 0x194   :  { %v255_v39 = vadd.f32 %v269_v34, %v243_v36  ;;  %v301_v41 = vpop.f32.mrf.mxu1 }
 0x195   :  { %v199_v40 = vpop.f32.mrf.mxu0 }
 0x196   :  { %v256_v42 = vadd.f32 %v255_v39, %v83_v17 }
 0x197   :  { %v295_v43 = vpop.f32.mrf.mxu0 }
 0x198   :  { %258 = vst.msk [vmem:[%s398_s8] sm:$0x3] %vm257_vm6, %v256_v42 }

// kernel: vunet_bottleneck_forward.7
= control target key start
LH: loop header
LB: loop body
LE: loop exit
PB: predicated region body
PF: predicated region fallthrough
CT: control target
= control target key end

     0   :  { %v485_v0 = vmov 0.0   ;;  %vm486_vm0 = vmmov 0   ;;  %vm70_vm2 = vcmask 261120   ;;  %vm387_vm5 = vcmask 254976   ;;  %s631_s2 = inlined_call_operand.vmem [shape: bf16[32,32], index: 2, kind: input, shape index: {}]   ;;  %s632_s1 = inlined_call_operand.vmem [shape: f32[2,32], index: 1, kind: input, shape index: {}]   ;;  %s633_s3 = inlined_call_operand.vmem [shape: bf16[32,32], index: 3, kind: input, shape index: {}]   ;;  %s634_s0 = inlined_call_operand.vmem [shape: f32[2,32], index: 0, kind: input, shape index: {}]   ;;  %s635_s4 = inlined_call_operand.vmem [shape: bf16[32,32], index: 4, kind: input, shape index: {}]   ;;  %s636_s7 = inlined_call_operand.vmem [shape: f32[1,32], index: 7, kind: input, shape index: {}]   ;;  %s637_s5 = inlined_call_operand.vmem [shape: bf16[32,32], index: 5, kind: input, shape index: {}]   ;;  %s638_s6 = inlined_call_operand.vmem [shape: bf16[32,8], index: 6, kind: input, shape index: {}]   ;;  %s639_s8 = inlined_call_operand.vmem [shape: f32[1,32], index: 8, kind: input, shape index: {}]   ;;  %s640_s11 = inlined_call_operand.vmem [shape: f32[2,32], index: 11, kind: output, shape index: {0}]   ;;  %s641_s9 = inlined_call_operand.vmem [shape: f32[1,32], index: 9, kind: input, shape index: {}]   ;;  %s642_s10 = inlined_call_operand.vmem [shape: f32[1,8], index: 10, kind: input, shape index: {}]   ;;  %s643_s12 = inlined_call_operand.vmem [shape: f32[2,8], index: 12, kind: output, shape index: {1}]  }
   0x1   :  { %433 = vmatprep.subr.bf16.mxu0 %v485_v0  ;;  %v475_v1 = vld [vmem:[%s631_s2 + $0x8] sm:$0xff]   ;;  %437 = vmatprep.mubr.msk.bf16.mxu0 %vm486_vm0, %v485_v0  ;;  %v476_v2 = vld [vmem:[%s631_s2] sm:$0xff]   ;;  %vm389_vm7 = vcmask 58368  }
   0x2   :  { %441 = vmatprep.subr.bf16.mxu1 %v485_v0  ;;  %445 = vmatprep.mubr.msk.bf16.mxu1 %vm486_vm0, %v485_v0  ;;  %v42_v3 = vld [vmem:[%s632_s1] sm:$0x3]  ;;  %v477_v7 = vld [vmem:[%s633_s3 + $0x8] sm:$0xff]  }
   0x3   :  { %434 = vmatpush3.bf16.msra.mxu0 %v475_v1  ;;  %vm43_vm1 = vcmp.ge.f32.partialorder %v42_v3, 0.0  ;;  %v44_v4 = vmul.f32 0.01, %v42_v3  ;;  %v478_v8 = vld [vmem:[%s633_s3] sm:$0xff]   ;;  %v479_v11 = vld [vmem:[%s635_s4 + $0x8] sm:$0xff]  }
   0x4   :  { %435 = vmatprep.subr.bf16.mxu0 %v485_v0  ;;  %v41_v9 = vld [vmem:[%s634_s0] sm:$0x3]  ;;  %442 = vmatpush3.bf16.msra.mxu1 %v479_v11  ;;  %v481_v28 = vld [vmem:[%s637_s5 + $0x8] sm:$0xff]  }
   0x5   :  { %v45_v5 = vsel %vm43_vm1, %v42_v3, %v44_v4  ;;  %v115_v10 = vmul.f32 0.01, %v41_v9  ;;  %vm114_vm3 = vcmp.ge.f32.partialorder %v41_v9, 0.0  ;;  %443 = vmatprep.subr.bf16.mxu1 %v485_v0  ;;  %v480_v14 = vld [vmem:[%s635_s4] sm:$0xff]   ;;  %v483_v30 = vld [vmem:[%s638_s6 + $0x8] sm:$0xff]  }
   0x6   :  { %v46_v6 = vpack.c.bf16 %v45_v5, %v45_v5  ;;  %v399_v15 = vld [vmem:[%s636_s7] ss:$0 sm:$0xff] }
   0x7   :  { %436 = vmatpush3.bf16.msra.mxu0 %v476_v2  ;;  %v116_v12 = vsel %vm114_vm3, %v41_v9, %v115_v10  ;;  %v482_v29 = vld [vmem:[%s637_s5] sm:$0xff]  }
   0x8   :  { %449 = vmatprep.subr.bf16.mxu0 %v485_v0  ;;  %v117_v13 = vpack.c.bf16 %v116_v12, %v116_v12  ;;  %444 = vmatpush3.bf16.msra.mxu1 %v480_v14  ;;  %v409_v32 = vld [vmem:[%s639_s8] ss:$0 sm:$0xff] }
   0x9   :  { %457 = vmatprep.subr.bf16.mxu1 %v485_v0  ;;  %v484_v42 = vld [vmem:[%s638_s6] sm:$0xff]  }
   0xa   :  { %438 = vmatmul.mubr.msk.bf16.vlgmr.msra.gmra.mxu0 %vm70_vm2, %v46_v6  ;;  %v410_v43 = vld [vmem:[%s641_s9] ss:$0 sm:$0xff] }
   0xb   :  { %450 = vmatpush3.bf16.msra.mxu0 %v477_v7  ;;  %453 = vmatprep.mubr.msk.bf16.mxu0 %vm486_vm0, %v485_v0  ;;  %v414_v51 = vld [vmem:[%s642_s10] ss:$0 sm:$0xff] }
   0xc   :  { %451 = vmatprep.subr.bf16.mxu0 %v485_v0 }
   0xf   :  { %452 = vmatpush3.bf16.msra.mxu0 %v478_v8 }
  0x10   :  { %465 = vmatprep.subr.bf16.mxu0 %v485_v0 }
  0x12   :  { %454 = vmatmul.mubr.msk.bf16.vlgmr.msra.gmra.mxu0 %vm70_vm2, %v117_v13 }
  0x13   :  { %469 = vmatprep.mubr.msk.bf16.mxu0 %vm486_vm0, %v485_v0  ;;  %466 = vmatpush3.bf16.msra.mxu0 %v483_v30 }
  0x14   :  { %467 = vmatprep.subr.bf16.mxu0 %v485_v0 }
  0x17   :  { %468 = vmatpush3.bf16.msra.mxu0 %v484_v42 }
  0xca   :  { %v108_v16 = vpop.f32.mrf.mxu0 }
  0xcb   :  { %v109_v17 = vadd.f32 %v399_v15, %v108_v16 }
  0xcc   :  { %v439_v18 = vpop.f32.mrf.mxu0 }
  0xcd   :  { %vm122_vm4 = vcmp.ge.f32.partialorder %v109_v17, 0.0  ;;  %v123_v19 = vmul.f32 0.01, %v109_v17 }
  0xce   :  { %v111_v20 = vpop.f32.mrf.mxu0 }
  0xcf   :  { %v124_v21 = vsel %vm122_vm4, %v109_v17, %v123_v19 }
  0xd0   :  { %v125_v22 = vpack.c.bf16 %v124_v21, %v124_v21  ;;  %v440_v23 = vpop.f32.mrf.mxu0 }
  0xd2   :  { %446 = vmatmul.mubr.msk.bf16.vlgmr.msra.gmra.mxu1 %vm70_vm2, %v125_v22  ;;  %v234_v24 = vpop.f32.mrf.mxu0 }
  0xd3   :  { %461 = vmatprep.mubr.msk.bf16.mxu1 %vm486_vm0, %v485_v0  ;;  %458 = vmatpush3.bf16.msra.mxu1 %v481_v28 }
  0xd4   :  { %v455_v25 = vpop.f32.mrf.mxu0  ;;  %459 = vmatprep.subr.bf16.mxu1 %v485_v0 }
  0xd6   :  { %v237_v26 = vpop.f32.mrf.mxu0 }
  0xd7   :  { %460 = vmatpush3.bf16.msra.mxu1 %v482_v29 }
  0xd8   :  { %v456_v27 = vpop.f32.mrf.mxu0 }
 0x192   :  { %v179_v31 = vpop.f32.mrf.mxu1 }
 0x193   :  { %v235_v33 = vadd.f32 %v234_v24, %v179_v31 }
 0x194   :  { %v447_v34 = vpop.f32.mrf.mxu1 }
 0x195   :  { %v247_v35 = vadd.f32 %v409_v32, %v235_v33 }
 0x196   :  { %v182_v36 = vpop.f32.mrf.mxu1 }
 0x197   :  { %v248_v37 = vadd.f32 %v247_v35, %v41_v9 }
 0x198   :  { %v448_v38 = vpop.f32.mrf.mxu1 }
 0x199   :  { %388 = vst.msk [vmem:[%s640_s11] sm:$0x3] %vm387_vm5, %v248_v37  ;;  %vm249_vm6 = vcmp.ge.f32.partialorder %v248_v37, 0.0  ;;  %v250_v39 = vmul.f32 0.01, %v248_v37 }
 0x19b   :  { %v251_v40 = vsel %vm249_vm6, %v248_v37, %v250_v39 }
 0x19c   :  { %v252_v41 = vpack.c.bf16 %v251_v40, %v251_v40 }
 0x19e   :  { %462 = vmatmul.mubr.msk.bf16.vlgmr.msra.gmra.mxu1 %vm70_vm2, %v252_v41 }
 0x25e   :  { %v313_v44 = vpop.f32.mrf.mxu1 }
 0x25f   :  { %v314_v45 = vadd.f32 %v410_v43, %v313_v44 }
 0x260   :  { %v463_v46 = vpop.f32.mrf.mxu1 }
 0x261   :  { %v319_v47 = vadd.f32 %v314_v45, %v248_v37 }
 0x262   :  { %v316_v48 = vpop.f32.mrf.mxu1 }
 0x263   :  { %v320_v49 = vpack.c.bf16 %v319_v47, %v319_v47 }
 0x264   :  { %v464_v50 = vpop.f32.mrf.mxu1 }
 0x265   :  { %470 = vmatmul.mubr.msk.bf16.vlgmr.msra.gmra.mxu0 %vm70_vm2, %v320_v49 }
 0x325   :  { %v381_v52 = vpop.f32.mrf.mxu0 }
 0x326   :  { %v382_v53 = vadd.f32 %v414_v51, %v381_v52 }
 0x327   :  { %v471_v54 = vpop.f32.mrf.mxu0 }
 0x328   :  { %390 = vst.msk [vmem:[%s643_s12] sm:$0x3] %vm389_vm7, %v382_v53 }
 0x329   :  { %v384_v55 = vpop.f32.mrf.mxu0 }
 0x32b   :  { %v472_v56 = vpop.f32.mrf.mxu0 }

// kernel: vunet_bottleneck_forward.6
= control target key start
LH: loop header
LB: loop body
LE: loop exit
PB: predicated region body
PF: predicated region fallthrough
CT: control target
= control target key end

     0   :  { %vm56_vm0 = vcmask 1043456   ;;  %v444_v0 = vmov 0.0   ;;  %vm445_vm1 = vmmov 0   ;;  %vm52_vm2 = vcmask 64512   ;;  %s588_s4 = inlined_call_operand.vmem [shape: bf16[8,8], index: 4, kind: input, shape index: {}]   ;;  %s589_s3 = inlined_call_operand.vmem [shape: bf16[8,8], index: 3, kind: input, shape index: {}]   ;;  %s590_s1 = inlined_call_operand.vmem [shape: f32[2,8], index: 1, kind: input, shape index: {}]   ;;  %s591_s0 = inlined_call_operand.vmem [shape: f32[2,8], index: 0, kind: input, shape index: {}]   ;;  %s592_s5 = inlined_call_operand.vmem [shape: bf16[8,8], index: 5, kind: input, shape index: {}]   ;;  %s593_s9 = inlined_call_operand.vmem [shape: f32[1,8], index: 9, kind: input, shape index: {}]   ;;  %s594_s6 = inlined_call_operand.vmem [shape: bf16[8,8], index: 6, kind: input, shape index: {}]   ;;  %s595_s2 = inlined_call_operand.vmem [shape: f32[2,8], index: 2, kind: input, shape index: {}]   ;;  %s596_s7 = inlined_call_operand.vmem [shape: bf16[8,8], index: 7, kind: input, shape index: {}]   ;;  %s597_s10 = inlined_call_operand.vmem [shape: f32[1,8], index: 10, kind: input, shape index: {}]   ;;  %s598_s8 = inlined_call_operand.vmem [shape: bf16[8,32], index: 8, kind: input, shape index: {}]   ;;  %s599_s11 = inlined_call_operand.vmem [shape: f32[1,8], index: 11, kind: input, shape index: {}]   ;;  %s600_s12 = inlined_call_operand.vmem [shape: f32[1,32], index: 12, kind: input, shape index: {}]   ;;  %s601_s13 = inlined_call_operand.vmem [shape: f32[2,32], index: 13, kind: output, shape index: {}]  }
   0x1   :  { %406 = vmatprep.subr.bf16.mxu0 %v444_v0  ;;  %412 = vmatprep.subr.bf16.mxu1 %v444_v0  ;;  %v51_v1 = vld [vmem:[%s588_s4] sm:$0xf]  ;;  %vm378_vm6 = vcmask 254976  }
   0x2   :  { %v49_v2 = vld [vmem:[%s589_s3] sm:$0xf]  ;;  %v58_v4 = vsel %vm56_vm0, %v51_v1, 0  ;;  %408 = vmatprep.mubr.msk.bf16.mxu0 %vm445_vm1, %v444_v0  ;;  %414 = vmatprep.mubr.msk.bf16.mxu1 %vm445_vm1, %v444_v0 }
   0x3   :  { %v46_v3 = vld [vmem:[%s590_s1] sm:$0x3]  ;;  %v104_v5 = vsel %vm56_vm0, %v49_v2, 0  ;;  %407 = vmatpush3.bf16.msra.mxu0 %v58_v4 }
   0x4   :  { %v50_v6 = vpack.c.bf16 %v46_v3, %v46_v3  ;;  %v45_v7 = vld [vmem:[%s591_s0] sm:$0x3]  ;;  %413 = vmatpush3.bf16.msra.mxu1 %v104_v5  ;;  %418 = vmatprep.subr.bf16.mxu0 %v444_v0 }
   0x5   :  { %v48_v8 = vpack.c.bf16 %v45_v7, %v45_v7  ;;  %424 = vmatprep.subr.bf16.mxu1 %v444_v0  ;;  %v158_v9 = vld [vmem:[%s592_s5] sm:$0xf] }
   0x6   :  { %409 = vmatmul.mubr.msk.bf16.vlgmr.msra.gmra.mxu0 %vm52_vm2, %v50_v6  ;;  %v170_v10 = vsel %vm56_vm0, %v158_v9, 0  ;;  %v386_v13 = vld [vmem:[%s593_s9] ss:$0 sm:$0xff] }
   0x7   :  { %415 = vmatmul.mubr.msk.bf16.vlgmr.msra.gmra.mxu1 %vm52_vm2, %v48_v8  ;;  %420 = vmatprep.mubr.msk.bf16.mxu0 %vm445_vm1, %v444_v0  ;;  %v216_v21 = vld [vmem:[%s594_s6] sm:$0xf] }
   0x8   :  { %426 = vmatprep.mubr.msk.bf16.mxu1 %vm445_vm1, %v444_v0  ;;  %419 = vmatpush3.bf16.msra.mxu0 %v170_v10  ;;  %v272_v26 = vsel %vm56_vm0, %v216_v21, 0  ;;  %v47_v27 = vld [vmem:[%s595_s2] sm:$0x3] }
   0x9   :  { %430 = vmatprep.subr.bf16.mxu0 %v444_v0  ;;  %v213_v28 = vmul.f32 0.01, %v47_v27  ;;  %vm212_vm4 = vcmp.ge.f32.partialorder %v47_v27, 0.0  ;;  %v221_v31 = vld [vmem:[%s596_s7] sm:$0xf] }
   0xa   :  { %v226_v32 = vsel %vm56_vm0, %v221_v31, 0  ;;  %v387_v33 = vld [vmem:[%s597_s10] ss:$0 sm:$0xff] }
   0xb   :  { %v214_v29 = vsel %vm212_vm4, %v47_v27, %v213_v28  ;;  %425 = vmatpush3.bf16.msra.mxu1 %v226_v32  ;;  %v324_v46 = vld [vmem:[%s598_s8] sm:$0xf] }
   0xc   :  { %v215_v30 = vpack.c.bf16 %v214_v29, %v214_v29  ;;  %436 = vmatprep.subr.bf16.mxu1 %v444_v0  ;;  %v336_v47 = vsel %vm56_vm0, %v324_v46, 0  ;;  %v391_v49 = vld [vmem:[%s599_s11] ss:$0 sm:$0xff] }
   0xd   :  { %v392_v57 = vld [vmem:[%s600_s12] ss:$0 sm:$0xff] }
  0xc6   :  { %v94_v11 = vpop.f32.mrf.mxu0 }
  0xc7   :  { %v140_v12 = vpop.f32.mrf.mxu1 }
  0xc8   :  { %v141_v14 = vadd.f32 %v140_v12, %v94_v11  ;;  %v410_v15 = vpop.f32.mrf.mxu0 }
  0xc9   :  { %v416_v16 = vpop.f32.mrf.mxu1 }
  0xca   :  { %v153_v17 = vadd.f32 %v386_v13, %v141_v14  ;;  %v97_v18 = vpop.f32.mrf.mxu0 }
  0xcb   :  { %v143_v19 = vpop.f32.mrf.mxu1 }
  0xcc   :  { %vm154_vm3 = vcmp.ge.f32.partialorder %v153_v17, 0.0  ;;  %v155_v20 = vmul.f32 0.01, %v153_v17  ;;  %v411_v22 = vpop.f32.mrf.mxu0 }
  0xcd   :  { %v417_v23 = vpop.f32.mrf.mxu1 }
  0xce   :  { %v156_v24 = vsel %vm154_vm3, %v153_v17, %v155_v20 }
  0xcf   :  { %v157_v25 = vpack.c.bf16 %v156_v24, %v156_v24 }
  0xd1   :  { %421 = vmatmul.mubr.msk.bf16.vlgmr.msra.gmra.mxu0 %vm52_vm2, %v157_v25 }
  0xd2   :  { %431 = vmatpush3.bf16.msra.mxu0 %v272_v26  ;;  %432 = vmatprep.mubr.msk.bf16.mxu0 %vm445_vm1, %v444_v0 }
  0xd9   :  { %433 = vmatmul.mubr.msk.bf16.vlgmr.msra.gmra.mxu0 %vm52_vm2, %v215_v30 }
 0x191   :  { %v206_v34 = vpop.f32.mrf.mxu0 }
 0x192   :  { %v207_v35 = vadd.f32 %v387_v33, %v206_v34 }
 0x193   :  { %v422_v36 = vpop.f32.mrf.mxu0 }
 0x194   :  { %vm217_vm5 = vcmp.ge.f32.partialorder %v207_v35, 0.0  ;;  %v218_v37 = vmul.f32 0.01, %v207_v35 }
 0x195   :  { %v209_v38 = vpop.f32.mrf.mxu0 }
 0x196   :  { %v219_v39 = vsel %vm217_vm5, %v207_v35, %v218_v37 }
 0x197   :  { %v220_v40 = vpack.c.bf16 %v219_v39, %v219_v39  ;;  %v423_v41 = vpop.f32.mrf.mxu0 }
 0x199   :  { %427 = vmatmul.mubr.msk.bf16.vlgmr.msra.gmra.mxu1 %vm52_vm2, %v220_v40  ;;  %v308_v42 = vpop.f32.mrf.mxu0 }
 0x19a   :  { %438 = vmatprep.mubr.msk.bf16.mxu1 %vm445_vm1, %v444_v0  ;;  %437 = vmatpush3.bf16.msra.mxu1 %v336_v47 }
 0x19b   :  { %v434_v43 = vpop.f32.mrf.mxu0 }
 0x19d   :  { %v311_v44 = vpop.f32.mrf.mxu0 }
 0x19f   :  { %v435_v45 = vpop.f32.mrf.mxu0 }
 0x259   :  { %v262_v48 = vpop.f32.mrf.mxu1 }
 0x25a   :  { %v309_v50 = vadd.f32 %v308_v42, %v262_v48 }
 0x25b   :  { %v428_v51 = vpop.f32.mrf.mxu1 }
 0x25c   :  { %v321_v52 = vadd.f32 %v391_v49, %v309_v50 }
 0x25d   :  { %v265_v53 = vpop.f32.mrf.mxu1 }
 0x25e   :  { %v322_v54 = vadd.f32 %v321_v52, %v47_v27 }
 0x25f   :  { %v429_v55 = vpop.f32.mrf.mxu1 }
 0x260   :  { %v323_v56 = vpack.c.bf16 %v322_v54, %v322_v54 }
 0x262   :  { %439 = vmatmul.mubr.msk.bf16.vlgmr.msra.gmra.mxu1 %vm52_vm2, %v323_v56 }
 0x322   :  { %v372_v58 = vpop.f32.mrf.mxu1 }
 0x323   :  { %v373_v59 = vadd.f32 %v392_v57, %v372_v58 }
 0x324   :  { %v440_v60 = vpop.f32.mrf.mxu1 }
 0x325   :  { %379 = vst.msk [vmem:[%s601_s13] sm:$0x3] %vm378_vm6, %v373_v59 }
 0x326   :  { %v375_v61 = vpop.f32.mrf.mxu1 }
 0x328   :  { %v441_v62 = vpop.f32.mrf.mxu1 }

// kernel: vunet_bottleneck_forward.9
= control target key start
LH: loop header
LB: loop body
LE: loop exit
PB: predicated region body
PF: predicated region fallthrough
CT: control target
= control target key end

     0   :  { %vm86_vm0 = vcmask 1043456   ;;  %v684_v0 = vmov 0.0   ;;  %vm685_vm1 = vmmov 0   ;;  %vm82_vm3 = vcmask 64512   ;;  %s916_s4 = inlined_call_operand.vmem [shape: bf16[8,8], index: 4, kind: input, shape index: {}]   ;;  %s917_s1 = inlined_call_operand.vmem [shape: f32[2,8], index: 1, kind: input, shape index: {}]   ;;  %s918_s0 = inlined_call_operand.vmem [shape: f32[2,8], index: 0, kind: input, shape index: {}]   ;;  %s919_s6 = inlined_call_operand.vmem [shape: bf16[8,8], index: 6, kind: input, shape index: {}]   ;;  %s920_s5 = inlined_call_operand.vmem [shape: bf16[8,8], index: 5, kind: input, shape index: {}]   ;;  %s921_s13 = inlined_call_operand.vmem [shape: f32[1,8], index: 13, kind: input, shape index: {}]   ;;  %s922_s2 = inlined_call_operand.vmem [shape: f32[2,8], index: 2, kind: input, shape index: {}]   ;;  %s923_s7 = inlined_call_operand.vmem [shape: bf16[8,8], index: 7, kind: input, shape index: {}]   ;;  %s924_s8 = inlined_call_operand.vmem [shape: bf16[8,8], index: 8, kind: input, shape index: {}]   ;;  %s925_s9 = inlined_call_operand.vmem [shape: bf16[8,8], index: 9, kind: input, shape index: {}]   ;;  %s926_s14 = inlined_call_operand.vmem [shape: f32[1,8], index: 14, kind: input, shape index: {}]   ;;  %s927_s15 = inlined_call_operand.vmem [shape: f32[1,8], index: 15, kind: input, shape index: {}]   ;;  %s928_s19 = inlined_call_operand.vmem [shape: f32[2,8], index: 19, kind: output, shape index: {0}]   ;;  %s929_s3 = inlined_call_operand.vmem [shape: f32[2,8], index: 3, kind: input, shape index: {}]   ;;  %s930_s10 = inlined_call_operand.vmem [shape: bf16[8,8], index: 10, kind: input, shape index: {}]   ;;  %s931_s11 = inlined_call_operand.vmem [shape: bf16[8,8], index: 11, kind: input, shape index: {}]   ;;  %s932_s12 = inlined_call_operand.vmem [shape: bf16[8,8], index: 12, kind: input, shape index: {}]   ;;  %s933_s16 = inlined_call_operand.vmem [shape: f32[1,8], index: 16, kind: input, shape index: {}]   ;;  %s934_s17 = inlined_call_operand.vmem [shape: f32[1,8], index: 17, kind: input, shape index: {}]   ;;  %s935_s20 = inlined_call_operand.vmem [shape: f32[2,8], index: 20, kind: output, shape index: {1}]   ;;  %s936_s18 = inlined_call_operand.vmem [shape: f32[1,8], index: 18, kind: input, shape index: {}]   ;;  %s937_s21 = inlined_call_operand.vmem [shape: f32[2,8], index: 21, kind: output, shape index: {2}]  }
   0x1   :  { %938 = sst [smem:[#allocation2_spill]] %s916_s4  ;;  %628 = vmatprep.subr.bf16.mxu0 %v684_v0  ;;  %630 = vmatprep.mubr.msk.bf16.mxu0 %vm685_vm1, %v684_v0  ;;  %v68_v19 = vld [vmem:[%s922_s2] sm:$0x3]  ;;  %vm579_vm7 = vcmask 58368  }
   0x2   :  { %939 = sst [smem:[#allocation3_spill]] %s917_s1  ;;  %634 = vmatprep.subr.bf16.mxu1 %v684_v0  ;;  %636 = vmatprep.mubr.msk.bf16.mxu1 %vm685_vm1, %v684_v0  ;;  %v245_v21 = vld [vmem:[%s923_s7] sm:$0xf]  ;;  %v242_v24 = vmul.f32 0.01, %v68_v19  ;;  %vm241_vm6 = vcmp.ge.f32.partialorder %v68_v19, 0.0 }
   0x3   :  { %940 = sst [smem:[#allocation4_spill]] %s918_s0  ;;  %v257_v27 = vsel %vm86_vm0, %v245_v21, 0  ;;  %v303_v34 = vld [vmem:[%s924_s8] sm:$0xf] }
   0x4   :  { %941 = sst [smem:[#allocation5_spill]] %s919_s6  ;;  %v243_v28 = vsel %vm241_vm6, %v68_v19, %v242_v24  ;;  %v359_v35 = vsel %vm86_vm0, %v303_v34, 0  ;;  %v308_v36 = vld [vmem:[%s925_s9] sm:$0xf] }
   0x5   :  { %942 = sst [smem:[#allocation6_spill]] %s920_s5  ;;  %v244_v29 = vpack.c.bf16 %v243_v28, %v243_v28  ;;  %v313_v37 = vsel %vm86_vm0, %v308_v36, 0  ;;  %v599_v39 = vld [vmem:[%s926_s14] ss:$0 sm:$0xff] }
   0x6   :  { %943 = sst [smem:[#allocation7_spill]] %s921_s13  ;;  %v600_v46 = vld [vmem:[%s927_s15] ss:$0 sm:$0xff] }
   0x7   :  { %s944_s26 = sld [smem:[#allocation2_spill]]  ;;  %v69_v53 = vld [vmem:[%s929_s3] sm:$0x3] }
   0x8   :  { %s945_s28 = sld [smem:[#allocation3_spill]]  ;;  %v414_v55 = vld [vmem:[%s930_s10] sm:$0xf]  ;;  %v411_v58 = vmul.f32 0.01, %v69_v53  ;;  %vm410_vm10 = vcmp.ge.f32.partialorder %v69_v53, 0.0 }
   0x9   :  { %s946_s5 = sld [smem:[#allocation4_spill]]  ;;  %v426_v61 = vsel %vm86_vm0, %v414_v55, 0 }
   0xa   :  { %s947_s22 = sld [smem:[#allocation5_spill]]  ;;  %v412_v62 = vsel %vm410_vm10, %v69_v53, %v411_v58 }
   0xb   :  { %s948_s24 = sld [smem:[#allocation6_spill]]  ;;  %v413_v63 = vpack.c.bf16 %v412_v62, %v412_v62 }
   0xd   :  { %v74_v1 = vld [vmem:[%s944_s26] sm:$0xf]  ;;  %s949_s26 = sld [smem:[#allocation7_spill]] }
   0xe   :  { %v67_v2 = vld [vmem:[%s945_s28] sm:$0x3]  ;;  %v88_v3 = vsel %vm86_vm0, %v74_v1, 0 }
   0xf   :  { %vm70_vm2 = vcmp.ge.f32.partialorder %v67_v2, 0.0  ;;  %v71_v4 = vmul.f32 0.01, %v67_v2  ;;  %629 = vmatpush3.bf16.msra.mxu0 %v88_v3  ;;  %v816_v7 = vld [vmem:[%s946_s5] sm:$0x3] }
  0x10   :  { %640 = vmatprep.subr.bf16.mxu0 %v684_v0  ;;  %v139_v8 = vld [vmem:[%s947_s22] sm:$0xf]  ;;  %v131_v10 = vmul.f32 0.01, %v816_v7  ;;  %vm130_vm4 = vcmp.ge.f32.partialorder %v816_v7, 0.0 }
  0x11   :  { %v72_v5 = vsel %vm70_vm2, %v67_v2, %v71_v4  ;;  %v134_v9 = vld [vmem:[%s948_s24] sm:$0xf]  ;;  %v144_v11 = vsel %vm86_vm0, %v139_v8, 0 }
  0x12   :  { %v73_v6 = vpack.c.bf16 %v72_v5, %v72_v5  ;;  %v190_v12 = vsel %vm86_vm0, %v134_v9, 0  ;;  %635 = vmatpush3.bf16.msra.mxu1 %v144_v11  ;;  %v132_v13 = vsel %vm130_vm4, %v816_v7, %v131_v10  ;;  %v472_v1 = vld [vmem:[%s931_s11] sm:$0xf] }
  0x13   :  { %646 = vmatprep.subr.bf16.mxu1 %v684_v0  ;;  %v133_v14 = vpack.c.bf16 %v132_v13, %v132_v13  ;;  %v595_v15 = vld [vmem:[%s949_s26] ss:$0 sm:$0xff]  ;;  %v528_v2 = vsel %vm86_vm0, %v472_v1, 0 }
  0x14   :  { %631 = vmatmul.mubr.msk.bf16.vlgmr.msra.gmra.mxu0 %vm82_vm3, %v73_v6  ;;  %v477_v3 = vld [vmem:[%s932_s12] sm:$0xf] }
  0x15   :  { %642 = vmatprep.mubr.msk.bf16.mxu0 %vm685_vm1, %v684_v0  ;;  %641 = vmatpush3.bf16.msra.mxu0 %v190_v12  ;;  %v482_v4 = vsel %vm86_vm0, %v477_v3, 0 }
  0x16   :  { %652 = vmatprep.subr.bf16.mxu0 %v684_v0 }
  0x1c   :  { %643 = vmatmul.mubr.msk.bf16.vlgmr.msra.gmra.mxu0 %vm82_vm3, %v133_v14 }
  0x1d   :  { %654 = vmatprep.mubr.msk.bf16.mxu0 %vm685_vm1, %v684_v0  ;;  %653 = vmatpush3.bf16.msra.mxu0 %v313_v37 }
  0x1e   :  { %664 = vmatprep.subr.bf16.mxu0 %v684_v0 }
  0xd4   :  { %v124_v16 = vpop.f32.mrf.mxu0 }
  0xd5   :  { %v125_v17 = vadd.f32 %v595_v15, %v124_v16  ;;  %v605_v16 = vld [vmem:[%s934_s17] ss:$0 sm:$0xff] }
  0xd6   :  { %v632_v18 = vpop.f32.mrf.mxu0 }
  0xd7   :  { %vm135_vm5 = vcmp.ge.f32.partialorder %v125_v17, 0.0  ;;  %v136_v20 = vmul.f32 0.01, %v125_v17 }
  0xd8   :  { %v127_v22 = vpop.f32.mrf.mxu0 }
  0xd9   :  { %v137_v23 = vsel %vm135_vm5, %v125_v17, %v136_v20 }
  0xda   :  { %v138_v25 = vpack.c.bf16 %v137_v23, %v137_v23  ;;  %v633_v26 = vpop.f32.mrf.mxu0 }
  0xdc   :  { %637 = vmatmul.mubr.msk.bf16.vlgmr.msra.gmra.mxu1 %vm82_vm3, %v138_v25  ;;  %v226_v30 = vpop.f32.mrf.mxu0 }
  0xdd   :  { %647 = vmatpush3.bf16.msra.mxu1 %v257_v27  ;;  %648 = vmatprep.mubr.msk.bf16.mxu1 %vm685_vm1, %v684_v0 }
  0xde   :  { %658 = vmatprep.subr.bf16.mxu1 %v684_v0  ;;  %v644_v31 = vpop.f32.mrf.mxu0 }
  0xdf   :  { %v609_v31 = vld [vmem:[%s936_s18] ss:$0 sm:$0xff] }
  0xe0   :  { %v229_v32 = vpop.f32.mrf.mxu0 }
  0xe2   :  { %v645_v33 = vpop.f32.mrf.mxu0 }
  0xe4   :  { %649 = vmatmul.mubr.msk.bf16.vlgmr.msra.gmra.mxu1 %vm82_vm3, %v244_v29 }
  0xe5   :  { %660 = vmatprep.mubr.msk.bf16.mxu1 %vm685_vm1, %v684_v0  ;;  %659 = vmatpush3.bf16.msra.mxu1 %v359_v35 }
  0xe6   :  { %670 = vmatprep.subr.bf16.mxu1 %v684_v0 }
 0x19c   :  { %v180_v38 = vpop.f32.mrf.mxu1 }
 0x19d   :  { %v227_v40 = vadd.f32 %v226_v30, %v180_v38 }
 0x19e   :  { %v638_v41 = vpop.f32.mrf.mxu1 }
 0x19f   :  { %v239_v42 = vadd.f32 %v599_v39, %v227_v40 }
 0x1a0   :  { %v183_v43 = vpop.f32.mrf.mxu1 }
 0x1a1   :  { %v240_v44 = vadd.f32 %v239_v42, %v816_v7 }
 0x1a2   :  { %v639_v45 = vpop.f32.mrf.mxu1 }
 0x1a3   :  { %vm299_vm8 = vcmp.ge.f32.partialorder %v240_v44, 0.0  ;;  %v300_v47 = vmul.f32 0.01, %v240_v44  ;;  %580 = vst.msk [vmem:[%s928_s19] sm:$0x3] %vm579_vm7, %v240_v44 }
 0x1a4   :  { %v293_v48 = vpop.f32.mrf.mxu1 }
 0x1a5   :  { %v294_v49 = vadd.f32 %v600_v46, %v293_v48  ;;  %v301_v50 = vsel %vm299_vm8, %v240_v44, %v300_v47 }
 0x1a6   :  { %v650_v51 = vpop.f32.mrf.mxu1  ;;  %v302_v52 = vpack.c.bf16 %v301_v50, %v301_v50 }
 0x1a7   :  { %vm304_vm9 = vcmp.ge.f32.partialorder %v294_v49, 0.0  ;;  %v305_v54 = vmul.f32 0.01, %v294_v49 }
 0x1a8   :  { %v296_v56 = vpop.f32.mrf.mxu1  ;;  %661 = vmatmul.mubr.msk.bf16.vlgmr.msra.gmra.mxu1 %vm82_vm3, %v302_v52 }
 0x1a9   :  { %v306_v57 = vsel %vm304_vm9, %v294_v49, %v305_v54  ;;  %672 = vmatprep.mubr.msk.bf16.mxu1 %vm685_vm1, %v684_v0  ;;  %671 = vmatpush3.bf16.msra.mxu1 %v482_v4 }
 0x1aa   :  { %v307_v59 = vpack.c.bf16 %v306_v57, %v306_v57  ;;  %v651_v60 = vpop.f32.mrf.mxu1 }
 0x1ac   :  { %655 = vmatmul.mubr.msk.bf16.vlgmr.msra.gmra.mxu0 %vm82_vm3, %v307_v59 }
 0x1ad   :  { %665 = vmatpush3.bf16.msra.mxu0 %v426_v61  ;;  %666 = vmatprep.mubr.msk.bf16.mxu0 %vm685_vm1, %v684_v0 }
 0x1ae   :  { %676 = vmatprep.subr.bf16.mxu0 %v684_v0 }
 0x1b4   :  { %667 = vmatmul.mubr.msk.bf16.vlgmr.msra.gmra.mxu0 %vm82_vm3, %v413_v63 }
 0x1b5   :  { %678 = vmatprep.mubr.msk.bf16.mxu0 %vm685_vm1, %v684_v0  ;;  %677 = vmatpush3.bf16.msra.mxu0 %v528_v2  ;;  %v604_v0 = vld [vmem:[%s933_s16] ss:$0 sm:$0xff] }
 0x268   :  { %v395_v5 = vpop.f32.mrf.mxu1 }
 0x26a   :  { %v662_v6 = vpop.f32.mrf.mxu1 }
 0x26c   :  { %v349_v7 = vpop.f32.mrf.mxu0  ;;  %v398_v8 = vpop.f32.mrf.mxu1 }
 0x26d   :  { %v396_v9 = vadd.f32 %v395_v5, %v349_v7 }
 0x26e   :  { %v656_v10 = vpop.f32.mrf.mxu0  ;;  %v663_v11 = vpop.f32.mrf.mxu1 }
 0x26f   :  { %v408_v12 = vadd.f32 %v604_v0, %v396_v9 }
 0x270   :  { %v352_v13 = vpop.f32.mrf.mxu0 }
 0x271   :  { %v409_v14 = vadd.f32 %v408_v12, %v240_v44 }
 0x272   :  { %v657_v15 = vpop.f32.mrf.mxu0 }
 0x273   :  { %vm468_vm11 = vcmp.ge.f32.partialorder %v409_v14, 0.0  ;;  %v469_v17 = vmul.f32 0.01, %v409_v14  ;;  %581 = vst.msk [vmem:[%s935_s20] sm:$0x3] %vm579_vm7, %v409_v14 }
 0x274   :  { %v462_v18 = vpop.f32.mrf.mxu0 }
 0x275   :  { %v463_v19 = vadd.f32 %v605_v16, %v462_v18  ;;  %v470_v20 = vsel %vm468_vm11, %v409_v14, %v469_v17 }
 0x276   :  { %v668_v21 = vpop.f32.mrf.mxu0  ;;  %v471_v22 = vpack.c.bf16 %v470_v20, %v470_v20 }
 0x277   :  { %vm473_vm12 = vcmp.ge.f32.partialorder %v463_v19, 0.0  ;;  %v474_v23 = vmul.f32 0.01, %v463_v19 }
 0x278   :  { %v465_v24 = vpop.f32.mrf.mxu0  ;;  %679 = vmatmul.mubr.msk.bf16.vlgmr.msra.gmra.mxu0 %vm82_vm3, %v471_v22 }
 0x279   :  { %v475_v25 = vsel %vm473_vm12, %v463_v19, %v474_v23 }
 0x27a   :  { %v476_v26 = vpack.c.bf16 %v475_v25, %v475_v25  ;;  %v669_v27 = vpop.f32.mrf.mxu0 }
 0x27c   :  { %673 = vmatmul.mubr.msk.bf16.vlgmr.msra.gmra.mxu1 %vm82_vm3, %v476_v26 }
 0x338   :  { %v564_v28 = vpop.f32.mrf.mxu0 }
 0x33a   :  { %v680_v29 = vpop.f32.mrf.mxu0 }
 0x33c   :  { %v518_v30 = vpop.f32.mrf.mxu1  ;;  %v567_v32 = vpop.f32.mrf.mxu0 }
 0x33d   :  { %v565_v33 = vadd.f32 %v564_v28, %v518_v30 }
 0x33e   :  { %v674_v34 = vpop.f32.mrf.mxu1  ;;  %v681_v35 = vpop.f32.mrf.mxu0 }
 0x33f   :  { %v577_v36 = vadd.f32 %v609_v31, %v565_v33 }
 0x340   :  { %v521_v37 = vpop.f32.mrf.mxu1 }
 0x341   :  { %v578_v38 = vadd.f32 %v577_v36, %v409_v14 }
 0x342   :  { %v675_v39 = vpop.f32.mrf.mxu1 }
 0x343   :  { %582 = vst.msk [vmem:[%s937_s21] sm:$0x3] %vm579_vm7, %v578_v38 }

// kernel: vunet_bottleneck_forward.8
= control target key start
LH: loop header
LB: loop body
LE: loop exit
PB: predicated region body
PF: predicated region fallthrough
CT: control target
= control target key end

     0   :  { %v467_v0 = vmov 0.0   ;;  %vm468_vm0 = vmmov 0   ;;  %vm64_vm1 = vcmask 261120   ;;  %vm376_vm5 = vcmask 254976   ;;  %s605_s4 = inlined_call_operand.vmem [shape: bf16[32,32], index: 4, kind: input, shape index: {}]   ;;  %s606_s3 = inlined_call_operand.vmem [shape: bf16[32,32], index: 3, kind: input, shape index: {}]   ;;  %s607_s1 = inlined_call_operand.vmem [shape: f32[2,32], index: 1, kind: input, shape index: {}]   ;;  %s608_s0 = inlined_call_operand.vmem [shape: f32[2,32], index: 0, kind: input, shape index: {}]   ;;  %s609_s5 = inlined_call_operand.vmem [shape: bf16[32,32], index: 5, kind: input, shape index: {}]   ;;  %s610_s6 = inlined_call_operand.vmem [shape: bf16[32,32], index: 6, kind: input, shape index: {}]   ;;  %s611_s8 = inlined_call_operand.vmem [shape: f32[1,32], index: 8, kind: input, shape index: {}]   ;;  %s612_s2 = inlined_call_operand.vmem [shape: f32[2,32], index: 2, kind: input, shape index: {}]   ;;  %s613_s7 = inlined_call_operand.vmem [shape: bf16[32,32], index: 7, kind: input, shape index: {}]   ;;  %s614_s9 = inlined_call_operand.vmem [shape: f32[1,32], index: 9, kind: input, shape index: {}]   ;;  %s615_s10 = inlined_call_operand.vmem [shape: f32[1,32], index: 10, kind: input, shape index: {}]   ;;  %s616_s11 = inlined_call_operand.vmem [shape: f32[2,32], index: 11, kind: output, shape index: {}]  }
   0x1   :  { %415 = vmatprep.subr.bf16.mxu0 %v467_v0  ;;  %423 = vmatprep.subr.bf16.mxu1 %v467_v0  ;;  %v457_v1 = vld [vmem:[%s605_s4 + $0x8] sm:$0xff]   ;;  %v459_v3 = vld [vmem:[%s605_s4] sm:$0xff]  }
   0x2   :  { %v458_v2 = vld [vmem:[%s606_s3 + $0x8] sm:$0xff]   ;;  %419 = vmatprep.mubr.msk.bf16.mxu0 %vm468_vm0, %v467_v0  ;;  %427 = vmatprep.mubr.msk.bf16.mxu1 %vm468_vm0, %v467_v0  ;;  %v460_v4 = vld [vmem:[%s606_s3] sm:$0xff]  }
   0x3   :  { %416 = vmatpush3.bf16.msra.mxu0 %v457_v1  ;;  %424 = vmatpush3.bf16.msra.mxu1 %v458_v2  ;;  %v40_v5 = vld [vmem:[%s607_s1] sm:$0x3]  ;;  %v461_v9 = vld [vmem:[%s609_s5 + $0x8] sm:$0xff]  }
   0x4   :  { %417 = vmatprep.subr.bf16.mxu0 %v467_v0  ;;  %425 = vmatprep.subr.bf16.mxu1 %v467_v0  ;;  %v39_v6 = vld [vmem:[%s608_s0] sm:$0x3]  ;;  %v47_v7 = vpack.c.bf16 %v40_v5, %v40_v5  ;;  %v463_v24 = vld [vmem:[%s610_s6 + $0x8] sm:$0xff]  }
   0x5   :  { %v42_v8 = vpack.c.bf16 %v39_v6, %v39_v6  ;;  %v462_v10 = vld [vmem:[%s609_s5] sm:$0xff]   ;;  %v465_v29 = vld [vmem:[%s613_s7 + $0x8] sm:$0xff]  }
   0x6   :  { %v388_v13 = vld [vmem:[%s611_s8] ss:$0 sm:$0xff] }
   0x7   :  { %418 = vmatpush3.bf16.msra.mxu0 %v459_v3  ;;  %426 = vmatpush3.bf16.msra.mxu1 %v460_v4  ;;  %v464_v26 = vld [vmem:[%s610_s6] sm:$0xff]  }
   0x8   :  { %431 = vmatprep.subr.bf16.mxu0 %v467_v0  ;;  %439 = vmatprep.subr.bf16.mxu1 %v467_v0  ;;  %v41_v27 = vld [vmem:[%s612_s2] sm:$0x3] }
   0x9   :  { %v242_v28 = vmul.f32 0.01, %v41_v27  ;;  %vm241_vm3 = vcmp.ge.f32.partialorder %v41_v27, 0.0  ;;  %v466_v32 = vld [vmem:[%s613_s7] sm:$0xff]  }
   0xa   :  { %420 = vmatmul.mubr.msk.bf16.vlgmr.msra.gmra.mxu0 %vm64_vm1, %v47_v7  ;;  %428 = vmatmul.mubr.msk.bf16.vlgmr.msra.gmra.mxu1 %vm64_vm1, %v42_v8  ;;  %v389_v33 = vld [vmem:[%s614_s9] ss:$0 sm:$0xff] }
   0xb   :  { %435 = vmatprep.mubr.msk.bf16.mxu0 %vm468_vm0, %v467_v0  ;;  %443 = vmatprep.mubr.msk.bf16.mxu1 %vm468_vm0, %v467_v0  ;;  %v243_v30 = vsel %vm241_vm3, %v41_v27, %v242_v28  ;;  %v399_v47 = vld [vmem:[%s615_s10] ss:$0 sm:$0xff] }
   0xc   :  { %432 = vmatpush3.bf16.msra.mxu0 %v461_v9  ;;  %v244_v31 = vpack.c.bf16 %v243_v30, %v243_v30  ;;  %440 = vmatpush3.bf16.msra.mxu1 %v465_v29 }
   0xd   :  { %433 = vmatprep.subr.bf16.mxu0 %v467_v0  ;;  %441 = vmatprep.subr.bf16.mxu1 %v467_v0 }
  0x10   :  { %434 = vmatpush3.bf16.msra.mxu0 %v462_v10  ;;  %442 = vmatpush3.bf16.msra.mxu1 %v466_v32 }
  0x11   :  { %447 = vmatprep.subr.bf16.mxu0 %v467_v0 }
  0xca   :  { %v102_v11 = vpop.f32.mrf.mxu0  ;;  %v157_v12 = vpop.f32.mrf.mxu1 }
  0xcb   :  { %v158_v14 = vadd.f32 %v157_v12, %v102_v11 }
  0xcc   :  { %v421_v15 = vpop.f32.mrf.mxu0  ;;  %v429_v16 = vpop.f32.mrf.mxu1 }
  0xcd   :  { %v170_v17 = vadd.f32 %v388_v13, %v158_v14 }
  0xce   :  { %v105_v18 = vpop.f32.mrf.mxu0  ;;  %v160_v19 = vpop.f32.mrf.mxu1 }
  0xcf   :  { %vm171_vm2 = vcmp.ge.f32.partialorder %v170_v17, 0.0  ;;  %v172_v20 = vmul.f32 0.01, %v170_v17 }
  0xd0   :  { %v422_v21 = vpop.f32.mrf.mxu0  ;;  %v430_v22 = vpop.f32.mrf.mxu1 }
  0xd1   :  { %v173_v23 = vsel %vm171_vm2, %v170_v17, %v172_v20 }
  0xd2   :  { %v174_v25 = vpack.c.bf16 %v173_v23, %v173_v23 }
  0xd4   :  { %436 = vmatmul.mubr.msk.bf16.vlgmr.msra.gmra.mxu0 %vm64_vm1, %v174_v25 }
  0xd5   :  { %448 = vmatpush3.bf16.msra.mxu0 %v463_v24  ;;  %451 = vmatprep.mubr.msk.bf16.mxu0 %vm468_vm0, %v467_v0 }
  0xd6   :  { %449 = vmatprep.subr.bf16.mxu0 %v467_v0 }
  0xd9   :  { %450 = vmatpush3.bf16.msra.mxu0 %v464_v26 }
  0xdc   :  { %452 = vmatmul.mubr.msk.bf16.vlgmr.msra.gmra.mxu0 %vm64_vm1, %v244_v31 }
 0x194   :  { %v235_v34 = vpop.f32.mrf.mxu0 }
 0x195   :  { %v236_v35 = vadd.f32 %v389_v33, %v235_v34 }
 0x196   :  { %v437_v36 = vpop.f32.mrf.mxu0 }
 0x197   :  { %vm249_vm4 = vcmp.ge.f32.partialorder %v236_v35, 0.0  ;;  %v250_v37 = vmul.f32 0.01, %v236_v35 }
 0x198   :  { %v238_v38 = vpop.f32.mrf.mxu0 }
 0x199   :  { %v251_v39 = vsel %vm249_vm4, %v236_v35, %v250_v37 }
 0x19a   :  { %v252_v40 = vpack.c.bf16 %v251_v39, %v251_v39  ;;  %v438_v41 = vpop.f32.mrf.mxu0 }
 0x19c   :  { %444 = vmatmul.mubr.msk.bf16.vlgmr.msra.gmra.mxu1 %vm64_vm1, %v252_v40  ;;  %v361_v42 = vpop.f32.mrf.mxu0 }
 0x19e   :  { %v453_v43 = vpop.f32.mrf.mxu0 }
 0x1a0   :  { %v364_v44 = vpop.f32.mrf.mxu0 }
 0x1a2   :  { %v454_v45 = vpop.f32.mrf.mxu0 }
 0x25c   :  { %v306_v46 = vpop.f32.mrf.mxu1 }
 0x25d   :  { %v362_v48 = vadd.f32 %v361_v42, %v306_v46 }
 0x25e   :  { %v445_v49 = vpop.f32.mrf.mxu1 }
 0x25f   :  { %v374_v50 = vadd.f32 %v399_v47, %v362_v48 }
 0x260   :  { %v309_v51 = vpop.f32.mrf.mxu1 }
 0x261   :  { %v375_v52 = vadd.f32 %v374_v50, %v41_v27 }
 0x262   :  { %v446_v53 = vpop.f32.mrf.mxu1 }
 0x263   :  { %377 = vst.msk [vmem:[%s616_s11] sm:$0x3] %vm376_vm5, %v375_v52 }

</bundles_post_ra>
